<compile_context>
chip_gen: v6e
topology: v6e:2x2x1
jax: 0.10.0
libtpu: 0.0.40
codegen_flags: <defaults>
</compile_context>

<pallas_src>
import jax
import jax.numpy as jnp
from jax.experimental import pallas as pl
from jax.experimental.pallas import tpu as pltpu


def _make_conv_bn_silu_kernel(kh, kw, stride, Ho, Wo, C1, C2p):
    """Fused conv (tap accumulation) + BN(eval) + SiLU kernel for one NHWC image."""
    HW = Ho * Wo

    def kernel(x_ref, w_ref, scale_ref, shift_ref, o_ref):
        # x_ref: (1, Hp, Wp, C1) bf16 halo-padded image
        # w_ref: (kh, kw, C1, C2p) bf16
        # scale_ref / shift_ref: (1, C2p) f32
        # o_ref: (1, Ho, Wo, C2p)
        x = x_ref[0]                                        # (Hp, Wp, C1)
        acc = jnp.zeros((HW, C2p), jnp.float32)
        for i in range(kh):                                 # static unrolled tap loop
            for j in range(kw):
                if stride == 1:
                    v = x[i:i + Ho, j:j + Wo, :]
                else:
                    v = jax.lax.slice(
                        x, (i, j, 0),
                        (i + (Ho - 1) * stride + 1, j + (Wo - 1) * stride + 1, C1),
                        (stride, stride, 1))
                acc = acc + jnp.dot(v.reshape(HW, C1), w_ref[i, j],
                                    preferred_element_type=jnp.float32)
        y = acc * scale_ref[...] + shift_ref[...]           # fused BatchNorm (eval)
        y = y * (1.0 / (1.0 + jnp.exp(-y)))                 # SiLU
        o_ref[0] = y.reshape(Ho, Wo, C2p).astype(o_ref.dtype)

    return kernel


def conv_bn_silu_nhwc(x_nhwc, weight_oihw, gamma, beta, running_mean, running_var,
                      *, stride=1, padding=None, dilation=1, eps=1e-5):
    """Forward of ultralytics `Conv` (conv -> bn -> SiLU). NHWC in / NHWC out."""
    assert dilation == 1, "dilation > 1 not implemented"
    N, H, W, C1 = x_nhwc.shape
    C2, C1w, kh, kw = weight_oihw.shape
    assert C1w == C1, "groups != 1 not implemented"
    s = stride
    p = kh // 2 if padding is None else padding             # autopad (d == 1)
    Ho = (H + 2 * p - kh) // s + 1
    Wo = (W + 2 * p - kw) // s + 1
    Hp, Wp = H + 2 * p, W + 2 * p
    C2p = -(-C2 // 128) * 128                               # lane-dense output width

    # halo-padded NHWC activations in bf16 (no kh*kw im2col blow-up in HBM)
    xp = jnp.pad(x_nhwc, ((0, 0), (p, p), (p, p), (0, 0))).astype(jnp.bfloat16)

    # weight OIHW -> (kh, kw, C1, C2), pad output channels to C2p, cast bf16
    w = jnp.transpose(weight_oihw, (2, 3, 1, 0))
    w = jnp.pad(w, ((0, 0), (0, 0), (0, 0), (0, C2p - C2))).astype(jnp.bfloat16)

    # fold BN (eval mode) into per-channel scale / shift, padded to C2p (pads -> 0)
    inv_std = 1.0 / jnp.sqrt(running_var.astype(jnp.float32) + eps)
    scale = gamma.astype(jnp.float32) * inv_std
    shift = beta.astype(jnp.float32) - running_mean.astype(jnp.float32) * scale
    scale = jnp.pad(scale, (0, C2p - C2)).reshape(1, C2p)
    shift = jnp.pad(shift, (0, C2p - C2)).reshape(1, C2p)

    kernel = _make_conv_bn_silu_kernel(kh, kw, s, Ho, Wo, C1, C2p)

    out = pl.pallas_call(
        kernel,
        out_shape=jax.ShapeDtypeStruct((N, Ho, Wo, C2p), x_nhwc.dtype),
        grid_spec=pltpu.PrefetchScalarGridSpec(
            num_scalar_prefetch=0,
            grid=(N,),
            in_specs=[
                pl.BlockSpec((1, Hp, Wp, C1), lambda n: (n, 0, 0, 0)),   # image
                pl.BlockSpec((kh, kw, C1, C2p), lambda n: (0, 0, 0, 0)),  # weight
                pl.BlockSpec((1, C2p), lambda n: (0, 0)),                 # bn scale
                pl.BlockSpec((1, C2p), lambda n: (0, 0)),                 # bn shift
            ],
            out_specs=pl.BlockSpec((1, Ho, Wo, C2p), lambda n: (n, 0, 0, 0)),
        ),
        compiler_params=pltpu.CompilerParams(
            dimension_semantics=("parallel",)),
    )(xp, w, scale, shift)

    return out[..., :C2]


def conv_bn_silu(x_nchw, weight_oihw, gamma, beta, running_mean, running_var,
                 *, stride=1, padding=None, dilation=1, eps=1e-5):
    """PyTorch-facing wrapper: NCHW in / NCHW out (module semantics preserved)."""
    x_nhwc = jnp.transpose(x_nchw, (0, 2, 3, 1))
    out_nhwc = conv_bn_silu_nhwc(
        x_nhwc, weight_oihw, gamma, beta, running_mean, running_var,
        stride=stride, padding=padding, dilation=dilation, eps=eps)
    return jnp.transpose(out_nhwc, (0, 3, 1, 2))


if __name__ == "__main__":
    # Module config: Conv(c1=4, c2=8, k=3, s=1) -> autopad p=1, SiLU act.
    N, C1, H, W = 2, 4, 16, 16
    C2, k, s = 8, 3, 1
    eps = 1e-5

    key = jax.random.PRNGKey(0)
    kx, kw_, kg, kb, km, kv = jax.random.split(key, 6)
    x = jax.random.normal(kx, (N, C1, H, W), dtype=jnp.float32)
    weight = jax.random.normal(kw_, (C2, C1, k, k), dtype=jnp.float32) * 0.1
    gamma = 1.0 + 0.1 * jax.random.normal(kg, (C2,), dtype=jnp.float32)
    beta = 0.1 * jax.random.normal(kb, (C2,), dtype=jnp.float32)
    running_mean = 0.1 * jax.random.normal(km, (C2,), dtype=jnp.float32)
    running_var = 0.5 + jnp.abs(jax.random.normal(kv, (C2,), dtype=jnp.float32))

    fwd = jax.jit(lambda a, b, c, d, e, f: conv_bn_silu(
        a, b, c, d, e, f, stride=s, padding=None, eps=eps))
    out = jax.block_until_ready(fwd(x, weight, gamma, beta, running_mean, running_var))

    # Reference: XLA conv with the same bf16 operands + f32 accumulation, then
    # BN(eval) + SiLU in f32 (matches the kernel's numerics).
    ref = jax.lax.conv_general_dilated(
        x.astype(jnp.bfloat16), weight.astype(jnp.bfloat16),
        window_strides=(s, s), padding=((k // 2, k // 2), (k // 2, k // 2)),
        dimension_numbers=("NCHW", "OIHW", "NCHW"),
        preferred_element_type=jnp.float32)
    sc = (gamma / jnp.sqrt(running_var + eps))[None, :, None, None]
    sh = (beta - running_mean * gamma / jnp.sqrt(running_var + eps))[None, :, None, None]
    ref = ref * sc + sh
    ref = ref * jax.nn.sigmoid(ref)

    assert out.shape == (N, C2, H, W)
    max_err = float(jnp.max(jnp.abs(out - ref.astype(out.dtype))))
    assert jnp.allclose(out, ref.astype(out.dtype), atol=2e-3, rtol=2e-3), max_err
    print("KERNEL_OK")
</pallas_src>

<mosaic_0001>
module attributes {stable_mosaic.version = 11 : i64} {
  func.func @kernel(%arg0: i32, %arg1: memref<1x18x18x4xbf16, #tpu.memory_space<vmem>>, %arg2: memref<3x3x4x128xbf16, #tpu.memory_space<vmem>>, %arg3: memref<1x128xf32, #tpu.memory_space<vmem>>, %arg4: memref<1x128xf32, #tpu.memory_space<vmem>>, %arg5: memref<1x16x16x128xf32, #tpu.memory_space<vmem>>) attributes {dimension_semantics = [#tpu.dimension_semantics<parallel>], iteration_bounds = array<i64: 2>, scalar_prefetch = 0 : i64, scratch_operands = 0 : i64, tpu.core_type = #tpu.core_type<tc>, window_params = [{transform_indices = @transform_0, window_bounds = array<i64: 1, 18, 18, 4>}, {pipeline_mode = #tpu.pipeline_mode<synchronous>, transform_indices = @transform_1, window_bounds = array<i64: 3, 3, 4, 128>}, {pipeline_mode = #tpu.pipeline_mode<synchronous>, transform_indices = @transform_2, window_bounds = array<i64: 1, 128>}, {pipeline_mode = #tpu.pipeline_mode<synchronous>, transform_indices = @transform_3, window_bounds = array<i64: 1, 128>}, {transform_indices = @transform_4, window_bounds = array<i64: 1, 16, 16, 128>}]} {
    %c0 = arith.constant 0 : index
    %c0_0 = arith.constant 0 : index
    %c0_1 = arith.constant 0 : index
    %c0_2 = arith.constant 0 : index
    %0 = vector.load %arg1[%c0, %c0_0, %c0_1, %c0_2] : memref<1x18x18x4xbf16, #tpu.memory_space<vmem>>, vector<1x18x18x4xbf16>
    %1 = vector.shape_cast %0 : vector<1x18x18x4xbf16> to vector<18x18x4xbf16>
    %cst = arith.constant 0.000000e+00 : f32
    %2 = vector.broadcast %cst : f32 to vector<256x128xf32>
    %3 = vector.extract_strided_slice %1 {offsets = [0, 0, 0], sizes = [16, 16, 4], strides = [1, 1, 1]} : vector<18x18x4xbf16> to vector<16x16x4xbf16>
    %4 = vector.shape_cast %3 : vector<16x16x4xbf16> to vector<256x4xbf16>
    %c0_3 = arith.constant 0 : index
    %c0_4 = arith.constant 0 : index
    %c0_5 = arith.constant 0 : index
    %c0_6 = arith.constant 0 : index
    %5 = vector.load %arg2[%c0_3, %c0_4, %c0_5, %c0_6] : memref<3x3x4x128xbf16, #tpu.memory_space<vmem>>, vector<1x1x4x128xbf16>
    %6 = vector.shape_cast %5 : vector<1x1x4x128xbf16> to vector<4x128xbf16>
    %cst_7 = arith.constant dense<0.000000e+00> : vector<256x128xf32>
    %7 = tpu.matmul %4, %6, %cst_7 {dimension_numbers = #tpu.dot_dimension_numbers<[1], [0], [0], [1], [0, 0, 1, 1], [], []>} : vector<256x4xbf16>, vector<4x128xbf16>, vector<256x128xf32> -> vector<256x128xf32>
    %8 = arith.addf %2, %7 : vector<256x128xf32>
    %9 = vector.extract_strided_slice %1 {offsets = [0, 1, 0], sizes = [16, 16, 4], strides = [1, 1, 1]} : vector<18x18x4xbf16> to vector<16x16x4xbf16>
    %10 = vector.shape_cast %9 : vector<16x16x4xbf16> to vector<256x4xbf16>
    %c0_8 = arith.constant 0 : index
    %c1 = arith.constant 1 : index
    %c0_9 = arith.constant 0 : index
    %c0_10 = arith.constant 0 : index
    %11 = vector.load %arg2[%c0_8, %c1, %c0_9, %c0_10] : memref<3x3x4x128xbf16, #tpu.memory_space<vmem>>, vector<1x1x4x128xbf16>
    %12 = vector.shape_cast %11 : vector<1x1x4x128xbf16> to vector<4x128xbf16>
    %cst_11 = arith.constant dense<0.000000e+00> : vector<256x128xf32>
    %13 = tpu.matmul %10, %12, %cst_11 {dimension_numbers = #tpu.dot_dimension_numbers<[1], [0], [0], [1], [0, 0, 1, 1], [], []>} : vector<256x4xbf16>, vector<4x128xbf16>, vector<256x128xf32> -> vector<256x128xf32>
    %14 = arith.addf %8, %13 : vector<256x128xf32>
    %15 = vector.extract_strided_slice %1 {offsets = [0, 2, 0], sizes = [16, 16, 4], strides = [1, 1, 1]} : vector<18x18x4xbf16> to vector<16x16x4xbf16>
    %16 = vector.shape_cast %15 : vector<16x16x4xbf16> to vector<256x4xbf16>
    %c0_12 = arith.constant 0 : index
    %c2 = arith.constant 2 : index
    %c0_13 = arith.constant 0 : index
    %c0_14 = arith.constant 0 : index
    %17 = vector.load %arg2[%c0_12, %c2, %c0_13, %c0_14] : memref<3x3x4x128xbf16, #tpu.memory_space<vmem>>, vector<1x1x4x128xbf16>
    %18 = vector.shape_cast %17 : vector<1x1x4x128xbf16> to vector<4x128xbf16>
    %cst_15 = arith.constant dense<0.000000e+00> : vector<256x128xf32>
    %19 = tpu.matmul %16, %18, %cst_15 {dimension_numbers = #tpu.dot_dimension_numbers<[1], [0], [0], [1], [0, 0, 1, 1], [], []>} : vector<256x4xbf16>, vector<4x128xbf16>, vector<256x128xf32> -> vector<256x128xf32>
    %20 = arith.addf %14, %19 : vector<256x128xf32>
    %21 = vector.extract_strided_slice %1 {offsets = [1, 0, 0], sizes = [16, 16, 4], strides = [1, 1, 1]} : vector<18x18x4xbf16> to vector<16x16x4xbf16>
    %22 = vector.shape_cast %21 : vector<16x16x4xbf16> to vector<256x4xbf16>
    %c1_16 = arith.constant 1 : index
    %c0_17 = arith.constant 0 : index
    %c0_18 = arith.constant 0 : index
    %c0_19 = arith.constant 0 : index
    %23 = vector.load %arg2[%c1_16, %c0_17, %c0_18, %c0_19] : memref<3x3x4x128xbf16, #tpu.memory_space<vmem>>, vector<1x1x4x128xbf16>
    %24 = vector.shape_cast %23 : vector<1x1x4x128xbf16> to vector<4x128xbf16>
    %cst_20 = arith.constant dense<0.000000e+00> : vector<256x128xf32>
    %25 = tpu.matmul %22, %24, %cst_20 {dimension_numbers = #tpu.dot_dimension_numbers<[1], [0], [0], [1], [0, 0, 1, 1], [], []>} : vector<256x4xbf16>, vector<4x128xbf16>, vector<256x128xf32> -> vector<256x128xf32>
    %26 = arith.addf %20, %25 : vector<256x128xf32>
    %27 = vector.extract_strided_slice %1 {offsets = [1, 1, 0], sizes = [16, 16, 4], strides = [1, 1, 1]} : vector<18x18x4xbf16> to vector<16x16x4xbf16>
    %28 = vector.shape_cast %27 : vector<16x16x4xbf16> to vector<256x4xbf16>
    %c1_21 = arith.constant 1 : index
    %c1_22 = arith.constant 1 : index
    %c0_23 = arith.constant 0 : index
    %c0_24 = arith.constant 0 : index
    %29 = vector.load %arg2[%c1_21, %c1_22, %c0_23, %c0_24] : memref<3x3x4x128xbf16, #tpu.memory_space<vmem>>, vector<1x1x4x128xbf16>
    %30 = vector.shape_cast %29 : vector<1x1x4x128xbf16> to vector<4x128xbf16>
    %cst_25 = arith.constant dense<0.000000e+00> : vector<256x128xf32>
    %31 = tpu.matmul %28, %30, %cst_25 {dimension_numbers = #tpu.dot_dimension_numbers<[1], [0], [0], [1], [0, 0, 1, 1], [], []>} : vector<256x4xbf16>, vector<4x128xbf16>, vector<256x128xf32> -> vector<256x128xf32>
    %32 = arith.addf %26, %31 : vector<256x128xf32>
    %33 = vector.extract_strided_slice %1 {offsets = [1, 2, 0], sizes = [16, 16, 4], strides = [1, 1, 1]} : vector<18x18x4xbf16> to vector<16x16x4xbf16>
    %34 = vector.shape_cast %33 : vector<16x16x4xbf16> to vector<256x4xbf16>
    %c1_26 = arith.constant 1 : index
    %c2_27 = arith.constant 2 : index
    %c0_28 = arith.constant 0 : index
    %c0_29 = arith.constant 0 : index
    %35 = vector.load %arg2[%c1_26, %c2_27, %c0_28, %c0_29] : memref<3x3x4x128xbf16, #tpu.memory_space<vmem>>, vector<1x1x4x128xbf16>
    %36 = vector.shape_cast %35 : vector<1x1x4x128xbf16> to vector<4x128xbf16>
    %cst_30 = arith.constant dense<0.000000e+00> : vector<256x128xf32>
    %37 = tpu.matmul %34, %36, %cst_30 {dimension_numbers = #tpu.dot_dimension_numbers<[1], [0], [0], [1], [0, 0, 1, 1], [], []>} : vector<256x4xbf16>, vector<4x128xbf16>, vector<256x128xf32> -> vector<256x128xf32>
    %38 = arith.addf %32, %37 : vector<256x128xf32>
    %39 = vector.extract_strided_slice %1 {offsets = [2, 0, 0], sizes = [16, 16, 4], strides = [1, 1, 1]} : vector<18x18x4xbf16> to vector<16x16x4xbf16>
    %40 = vector.shape_cast %39 : vector<16x16x4xbf16> to vector<256x4xbf16>
    %c2_31 = arith.constant 2 : index
    %c0_32 = arith.constant 0 : index
    %c0_33 = arith.constant 0 : index
    %c0_34 = arith.constant 0 : index
    %41 = vector.load %arg2[%c2_31, %c0_32, %c0_33, %c0_34] : memref<3x3x4x128xbf16, #tpu.memory_space<vmem>>, vector<1x1x4x128xbf16>
    %42 = vector.shape_cast %41 : vector<1x1x4x128xbf16> to vector<4x128xbf16>
    %cst_35 = arith.constant dense<0.000000e+00> : vector<256x128xf32>
    %43 = tpu.matmul %40, %42, %cst_35 {dimension_numbers = #tpu.dot_dimension_numbers<[1], [0], [0], [1], [0, 0, 1, 1], [], []>} : vector<256x4xbf16>, vector<4x128xbf16>, vector<256x128xf32> -> vector<256x128xf32>
    %44 = arith.addf %38, %43 : vector<256x128xf32>
    %45 = vector.extract_strided_slice %1 {offsets = [2, 1, 0], sizes = [16, 16, 4], strides = [1, 1, 1]} : vector<18x18x4xbf16> to vector<16x16x4xbf16>
    %46 = vector.shape_cast %45 : vector<16x16x4xbf16> to vector<256x4xbf16>
    %c2_36 = arith.constant 2 : index
    %c1_37 = arith.constant 1 : index
    %c0_38 = arith.constant 0 : index
    %c0_39 = arith.constant 0 : index
    %47 = vector.load %arg2[%c2_36, %c1_37, %c0_38, %c0_39] : memref<3x3x4x128xbf16, #tpu.memory_space<vmem>>, vector<1x1x4x128xbf16>
    %48 = vector.shape_cast %47 : vector<1x1x4x128xbf16> to vector<4x128xbf16>
    %cst_40 = arith.constant dense<0.000000e+00> : vector<256x128xf32>
    %49 = tpu.matmul %46, %48, %cst_40 {dimension_numbers = #tpu.dot_dimension_numbers<[1], [0], [0], [1], [0, 0, 1, 1], [], []>} : vector<256x4xbf16>, vector<4x128xbf16>, vector<256x128xf32> -> vector<256x128xf32>
    %50 = arith.addf %44, %49 : vector<256x128xf32>
    %51 = vector.extract_strided_slice %1 {offsets = [2, 2, 0], sizes = [16, 16, 4], strides = [1, 1, 1]} : vector<18x18x4xbf16> to vector<16x16x4xbf16>
    %52 = vector.shape_cast %51 : vector<16x16x4xbf16> to vector<256x4xbf16>
    %c2_41 = arith.constant 2 : index
    %c2_42 = arith.constant 2 : index
    %c0_43 = arith.constant 0 : index
    %c0_44 = arith.constant 0 : index
    %53 = vector.load %arg2[%c2_41, %c2_42, %c0_43, %c0_44] : memref<3x3x4x128xbf16, #tpu.memory_space<vmem>>, vector<1x1x4x128xbf16>
    %54 = vector.shape_cast %53 : vector<1x1x4x128xbf16> to vector<4x128xbf16>
    %cst_45 = arith.constant dense<0.000000e+00> : vector<256x128xf32>
    %55 = tpu.matmul %52, %54, %cst_45 {dimension_numbers = #tpu.dot_dimension_numbers<[1], [0], [0], [1], [0, 0, 1, 1], [], []>} : vector<256x4xbf16>, vector<4x128xbf16>, vector<256x128xf32> -> vector<256x128xf32>
    %56 = arith.addf %50, %55 : vector<256x128xf32>
    %c0_46 = arith.constant 0 : index
    %c0_47 = arith.constant 0 : index
    %57 = vector.load %arg3[%c0_46, %c0_47] : memref<1x128xf32, #tpu.memory_space<vmem>>, vector<1x128xf32>
    %58 = vector.broadcast %57 : vector<1x128xf32> to vector<256x128xf32>
    %59 = arith.mulf %56, %58 : vector<256x128xf32>
    %c0_48 = arith.constant 0 : index
    %c0_49 = arith.constant 0 : index
    %60 = vector.load %arg4[%c0_48, %c0_49] : memref<1x128xf32, #tpu.memory_space<vmem>>, vector<1x128xf32>
    %61 = vector.broadcast %60 : vector<1x128xf32> to vector<256x128xf32>
    %62 = arith.addf %59, %61 : vector<256x128xf32>
    %cst_50 = arith.constant 0.000000e+00 : f32
    %63 = vector.broadcast %cst_50 : f32 to vector<256x128xf32>
    %64 = arith.subf %63, %62 : vector<256x128xf32>
    %65 = math.exp %64 : vector<256x128xf32>
    %cst_51 = arith.constant 1.000000e+00 : f32
    %66 = vector.broadcast %cst_51 : f32 to vector<256x128xf32>
    %67 = arith.addf %66, %65 : vector<256x128xf32>
    %cst_52 = arith.constant 1.000000e+00 : f32
    %68 = vector.broadcast %cst_52 : f32 to vector<256x128xf32>
    %69 = arith.divf %68, %67 : vector<256x128xf32>
    %70 = arith.mulf %62, %69 : vector<256x128xf32>
    %71 = vector.shape_cast %70 : vector<256x128xf32> to vector<16x16x128xf32>
    %c0_53 = arith.constant 0 : index
    %c0_54 = arith.constant 0 : index
    %c0_55 = arith.constant 0 : index
    %c0_56 = arith.constant 0 : index
    %72 = vector.load %arg5[%c0_53, %c0_54, %c0_55, %c0_56] : memref<1x16x16x128xf32, #tpu.memory_space<vmem>>, vector<1x16x16x128xf32>
    %73 = vector.shape_cast %72 : vector<1x16x16x128xf32> to vector<16x16x128xf32>
    %74 = vector.shape_cast %71 : vector<16x16x128xf32> to vector<1x16x16x128xf32>
    tpu.vector_store %arg5[%c0_53, %c0_54, %c0_55, %c0_56], %74 {strides = array<i32>} : memref<1x16x16x128xf32, #tpu.memory_space<vmem>>, vector<1x16x16x128xf32>,
    return
  }
  func.func @transform_0(%arg0: i32) -> (i32, i32, i32, i32) {
    %c0_i32 = arith.constant 0 : i32
    %c0_i32_0 = arith.constant 0 : i32
    %c0_i32_1 = arith.constant 0 : i32
    %c0_i32_2 = arith.constant 0 : i32
    return %arg0, %c0_i32, %c0_i32_0, %c0_i32_1 : i32, i32, i32, i32
  }
  func.func @transform_1(%arg0: i32) -> (i32, i32, i32, i32) {
    %c0_i32 = arith.constant 0 : i32
    %c0_i32_0 = arith.constant 0 : i32
    %c0_i32_1 = arith.constant 0 : i32
    %c0_i32_2 = arith.constant 0 : i32
    %c0_i32_3 = arith.constant 0 : i32
    return %c0_i32, %c0_i32_0, %c0_i32_1, %c0_i32_2 : i32, i32, i32, i32
  }
  func.func @transform_2(%arg0: i32) -> (i32, i32) {
    %c0_i32 = arith.constant 0 : i32
    %c0_i32_0 = arith.constant 0 : i32
    %c0_i32_1 = arith.constant 0 : i32
    return %c0_i32, %c0_i32_0 : i32, i32
  }
  func.func @transform_3(%arg0: i32) -> (i32, i32) {
    %c0_i32 = arith.constant 0 : i32
    %c0_i32_0 = arith.constant 0 : i32
    %c0_i32_1 = arith.constant 0 : i32
    return %c0_i32, %c0_i32_0 : i32, i32
  }
  func.func @transform_4(%arg0: i32) -> (i32, i32, i32, i32) {
    %c0_i32 = arith.constant 0 : i32
    %c0_i32_0 = arith.constant 0 : i32
    %c0_i32_1 = arith.constant 0 : i32
    %c0_i32_2 = arith.constant 0 : i32
    return %arg0, %c0_i32, %c0_i32_0, %c0_i32_1 : i32, i32, i32, i32
  }
}

</mosaic_0001>

<bundles_post_ra>
// kernel: _lambda_.1
= control target key start
LH: loop header
LB: loop body
LE: loop exit
PB: predicated region body
PF: predicated region fallthrough
CT: control target
= control target key end

     0   :  { %s4199_s15 = smov 0   ;;  %s5851_s0 = inlined_call_operand.vmem [shape: bf16[2,18,18,4], index: 0, kind: input, shape index: {}]   ;;  %s5852_s1 = inlined_call_operand.vmem [shape: bf16[3,3,4,128], index: 1, kind: input, shape index: {}]   ;;  %s5853_s2 = inlined_call_operand.vmem [shape: f32[1,128], index: 2, kind: input, shape index: {}]   ;;  %s5854_s3 = inlined_call_operand.vmem [shape: f32[1,128], index: 3, kind: input, shape index: {}]   ;;  %s5855_s4 = inlined_call_operand.vmem [shape: f32[2,16,16,128], index: 4, kind: output, shape index: {}]  }
   0x1 LB: > { %s3303_s16 = sadd.s32 4294967295, %s4172_s15   ;;  %p3307_p0 = scmp.ge.s32.totalorder %s4172_s15, 1  ;;  %s4172_s15 = sphi %s4199_s15, %s14_s15  }
   0x2   : > { %p162_p1 = scmp.lt.s32.totalorder %s4172_s15, 3 }
   0x4   : > { %p163_p2 = pnand %p3307_p0, %p162_p1 }
   0x6   : > { %166 = sbr.rel (%p163_p2) target bundleno = 603 (0x25b), region = 36 }
   0xb   : > { %v3311_v0 = vld [vmem:[%s5852_s1 + $0x2] sm:$0x3]  ;;  %vm740_vm0 = vcmask 1041408   ;;  %p188_p3 = scmp.lt.s32.totalorder %s3303_s16, 1  ;;  %v253_v2 = vld [vmem:[%s5852_s1] sm:$0x3] }
   0xc   : > { %4002 = vmatprep.subr.msk.bf16.mxu1 %vm740_vm0, %v3311_v0  ;;  %4001 = vmatprep.subr.msk.bf16.mxu0 %vm740_vm0, %v3311_v0  ;;  %v742_v1 = vsel %vm740_vm0, %v3311_v0, 0  ;;  %v3392_v3 = vld [vmem:[%s5852_s1 + $0x4] sm:$0x3]  ;;  %vm254_vm1 = vsmask.f32 3328  ;;  %v4230_v4 = vsel %vm740_vm0, %v253_v2, 0 }
   0xd   : > { %4000 = vmatpush3.bf16.msra.mxu1 %v742_v1  ;;  %3694 = vmatpush3.bf16.msra.mxu0 %v742_v1  ;;  %s6005_s16 = smov (!%p188_p3, %s3303_s16), 1  ;;  %vm255_vm2 = vsmask.f32 7440  ;;  %v4233_v5 = vsel %vm740_vm0, %v3392_v3, 0  ;;  %vm691_vm3 = vcmask 31744   ;;  %v5899_v32 = vmov 0 }
   0xe   : > { %4003 = vmatprep.subr.msk.bf16.mxu1 %vm740_vm0, %v253_v2  ;;  %4004 = vmatprep.subr.msk.bf16.mxu0 %vm740_vm0, %v3392_v3  ;;  %s4011_s23 = smul.u32 216, %s6005_s16  ;;  %vm4272_vm4 = vmor %vm254_vm1, %vm255_vm2  ;;  %vm1213_vm5 = vcmask 1042432   ;;  %vm1214_vm6 = vcmask 1046532   ;;  %s3539_s19 = sshll.u32 %s6005_s16, 8 }
   0xf   : > { %v5900_v32 = vsel %vm4272_vm4, 4294967295, %v5899_v32  ;;  %vm4595_vm7 = vmor %vm1213_vm5, %vm1214_vm6  ;;  %s5677_s21 = scalar_lea.vmem %s5855_s4, %s3539_s19 }
  0x10   : > { %s4227_s26 = scalar_lea.vmem %s5851_s0, %s4011_s23  ;;  %5901 = vst [vmem:[#allocation2_spill] sm:$0xff] %v5900_v32 }
  0x11   : > { %v4236_v6 = vld [vmem:[%s4227_s26] sm:$0xf]  ;;  %v4239_v7 = vld [vmem:[%s4227_s26 + $0x4] sm:$0xf]  ;;  %v4242_v8 = vld [vmem:[%s4227_s26 + $0x8] sm:$0x1] }
  0x12   : > { %v258_v9 = vshrl.u32 %v4236_v6, 16  ;;  %v261_v10 = vshll.u32 %v4236_v6, 16  ;;  %v267_v11 = vshll.u32 %v4239_v7, 16  ;;  %v271_v12 = vshrl.u32 %v4239_v7, 16  ;;  %v4249_v13 = vld [vmem:[%s4227_s26 + $0x60] sm:$0xf] }
  0x13   : > { %v277_v14 = vshll.u32 %v4242_v8, 16  ;;  %v4254_v16 = vld [vmem:[%s4227_s26 + $0x64] sm:$0xf]  ;;  %v4257_v17 = vld [vmem:[%s4227_s26 + $0x68] sm:$0x1]  ;;  %v450_v23 = vshrl.u32 %v4249_v13, 16 }
  0x14   : > { %v260_v18 = vrot.slane %v258_v9, 4  ;;  %v263_v19 = vrot.slane %v261_v10, 5  ;;  %v269_v20 = vrot.slane %v267_v11, 5  ;;  %v273_v21 = vrot.slane %v271_v12, 4  ;;  %v4265_v30 = vld [vmem:[%s4227_s26 + $0xc] sm:$0xf] }
  0x15   : > { %v279_v22 = vrot.slane %v277_v14, 5  ;;  %v453_v24 = vshll.u32 %v4249_v13, 16  ;;  %v459_v25 = vshll.u32 %v4254_v16, 16  ;;  %v463_v28 = vshrl.u32 %v4254_v16, 16  ;;  %v4268_v31 = vld [vmem:[%s4227_s26 + $0x10] sm:$0xf] }
  0x16   : > { %v264_v26 = vor.u32 %v263_v19, %v260_v18  ;;  %v274_v27 = vor.u32 %v273_v21, %v269_v20  ;;  %v469_v29 = vshll.u32 %v4257_v17, 16  ;;  %v452_v33 = vrot.slane %v450_v23, 4  ;;  %v4279_v42 = vld [vmem:[%s4227_s26 + $0x14] sm:$0x1]  ;;  %v4290_v54 = vld [vmem:[%s4227_s26 + $0x6c] sm:$0xf] }
  0x17   : > { %v455_v34 = vrot.slane %v453_v24, 5  ;;  %v461_v35 = vrot.slane %v459_v25, 5  ;;  %v465_v39 = vrot.slane %v463_v28, 4  ;;  %v282_v43 = vshrl.u32 %v4265_v30, 16  ;;  %5902 = vst [vmem:[#allocation3_spill] sm:$0xff] %v4290_v54 }
  0x18   : > { %v265_v37 = vrot.slane %v264_v26, 4  ;;  %v275_v38 = vrot.slane %v274_v27, 4  ;;  %v471_v40 = vrot.slane %v469_v29, 5  ;;  %v285_v44 = vshll.u32 %v4265_v30, 16  ;;  %v4294_v59 = vld [vmem:[%s4227_s26 + $0x70] sm:$0xf] }
  0x19   : > { %v456_v41 = vor.u32 %v455_v34, %v452_v33  ;;  %v291_v45 = vshll.u32 %v4268_v31, 16  ;;  %v466_v48 = vor.u32 %v465_v39, %v461_v35  ;;  %v295_v49 = vshrl.u32 %v4268_v31, 16  ;;  %v4302_v0 = vld [vmem:[%s4227_s26 + $0x74] sm:$0x1]  ;;  %v4308_v10 = vld [vmem:[%s4227_s26 + $0x18] sm:$0xf] }
  0x1a   : > { %v270_v46 = vsel %vm4272_vm4, %v265_v37, %v269_v20  ;;  %v280_v47 = vsel %vm4272_vm4, %v275_v38, %v279_v22  ;;  %v284_v52 = vrot.slane %v282_v43, 4  ;;  %v287_v53 = vrot.slane %v285_v44, 5  ;;  %5903 = vst [vmem:[#allocation4_spill] sm:$0xff] %v4302_v0  ;;  %v4317_v23 = vld [vmem:[%s4227_s26 + $0x1c] sm:$0xf] }
  0x1b   : > { %v3312_v50 = vcombine.low %v270_v46, %v280_v47  ;;  %v457_v51 = vrot.slane %v456_v41, 4  ;;  %v467_v55 = vrot.slane %v466_v48, 4  ;;  %v293_v56 = vrot.slane %v291_v45, 5  ;;  %v4324_v27 = vld [vmem:[%s4227_s26 + $0x20] sm:$0x1] }
  0x1c   : > { %v297_v57 = vrot.slane %v295_v49, 4  ;;  %v301_v58 = vshll.u32 %v4279_v42, 16  ;;  %v288_v61 = vor.u32 %v287_v53, %v284_v52  ;;  %v474_v9 = vshrl.u32 %v4290_v54, 16  ;;  %v4331_v37 = vld [vmem:[%s4227_s26 + $0x78] sm:$0xf] }
  0x1d   : > { %3695 = vmatprep.mubr.msk.bf16.mxu0 %vm691_vm3, %v3312_v50  ;;  %v462_v60 = vsel %vm4272_vm4, %v457_v51, %v461_v35  ;;  %v472_v1 = vsel %vm4272_vm4, %v467_v55, %v471_v40  ;;  %v477_v14 = vshll.u32 %v4290_v54, 16  ;;  %v483_v18 = vshll.u32 %v4294_v59, 16  ;;  %5905 = vst [vmem:[#allocation6_spill] sm:$0xff] %v4331_v37  ;;  %v4339_v43 = vld [vmem:[%s5852_s1 + $0x8] sm:$0x3] }
  0x1e   : > { %v298_v2 = vor.u32 %v297_v57, %v293_v56  ;;  %v303_v3 = vrot.slane %v301_v58, 5  ;;  %v4310_v11 = vcombine.low %v462_v60, %v472_v1  ;;  %v289_v12 = vrot.slane %v288_v61, 4  ;;  %v4344_v48 = vld [vmem:[%s4227_s26 + $0x7c] sm:$0xf]  ;;  %v4352_v58 = vld [vmem:[%s4227_s26 + $0x80] sm:$0x1] }
  0x1f   : > { %v476_v20 = vrot.slane %v474_v9, 4  ;;  %v487_v21 = vshrl.u32 %v4294_v59, 16  ;;  %v493_v22 = vshll.u32 %v4302_v0, 16  ;;  %v479_v25 = vrot.slane %v477_v14, 5  ;;  %5907 = vst [vmem:[#allocation8_spill] sm:$0xff] %v4344_v48  ;;  %5908 = vst [vmem:[#allocation9_spill] sm:$0xff] %v4352_v58 }
  0x20   : > { %5904 = vst [vmem:[#allocation5_spill] sm:$0xff] %v4310_v11  ;;  %v299_v19 = vrot.slane %v298_v2, 4  ;;  %3711 = vmatprep.mubr.msk.bf16.mxu1 %vm691_vm3, %v4310_v11  ;;  %v294_v24 = vsel %vm4272_vm4, %v289_v12, %v293_v56  ;;  %v485_v26 = vrot.slane %v483_v18, 5  ;;  %v306_v28 = vshrl.u32 %v4308_v10, 16  ;;  %v4366_v18 = vld [vmem:[%s4227_s26 + $0x28] sm:$0xf] }
  0x21   : > { %v489_v33 = vrot.slane %v487_v21, 4  ;;  %v495_v34 = vrot.slane %v493_v22, 5  ;;  %v309_v35 = vshll.u32 %v4308_v10, 16  ;;  %v480_v39 = vor.u32 %v479_v25, %v476_v20 }
  0x22   : > { %v304_v29 = vsel %vm4272_vm4, %v299_v19, %v303_v3  ;;  %v308_v40 = vrot.slane %v306_v28, 4  ;;  %v315_v41 = vshll.u32 %v4317_v23, 16  ;;  %v319_v46 = vshrl.u32 %v4317_v23, 16  ;;  %v4358_v3 = vld [vmem:[%s4227_s26 + $0x24] sm:$0xf] }
  0x23   : > { %v4333_v38 = vcombine.low %v294_v24, %v304_v29  ;;  %v490_v44 = vor.u32 %v489_v33, %v485_v26  ;;  %v311_v45 = vrot.slane %v309_v35, 5  ;;  %v325_v47 = vshll.u32 %v4324_v27, 16  ;;  %v4374_v24 = vld [vmem:[%s5852_s1 + $0x6] sm:$0x3]  ;;  %v4379_v29 = vld [vmem:[%s4227_s26 + $0x2c] sm:$0x1] }
  0x24   : > { %v481_v49 = vrot.slane %v480_v39, 4  ;;  %v317_v50 = vrot.slane %v315_v41, 5  ;;  %v498_v51 = vshrl.u32 %v4331_v37, 16  ;;  %v501_v52 = vshll.u32 %v4331_v37, 16  ;;  %v4387_v41 = vld [vmem:[%s4227_s26 + $0x84] sm:$0xf] }
  0x25   : > { %5906 = vst [vmem:[#allocation7_spill] sm:$0xff] %v4333_v38  ;;  %3696 = vmatmul.mubr.msk.bf16.vlgmr.msra.gmra.mxu0 %vm691_vm3, %v4333_v38  ;;  %v491_v53 = vrot.slane %v490_v44, 4  ;;  %v312_v55 = vor.u32 %v311_v45, %v308_v40  ;;  %v321_v56 = vrot.slane %v319_v46, 4  ;;  %v327_v57 = vrot.slane %v325_v47, 5  ;;  %v4534_v38 = vld [vmem:[%s4227_s26 + $0xb0] sm:$0x1] }
  0x26   : > { %3762 = vmatpush3.bf16.msra.mxu0 %v4233_v5  ;;  %v486_v60 = vsel %vm4272_vm4, %v481_v49, %v485_v26  ;;  %v500_v61 = vrot.slane %v498_v51, 4  ;;  %v503_v1 = vrot.slane %v501_v52, 5  ;;  %v507_v2 = vshll.u32 %v4344_v48, 16  ;;  %v4394_v49 = vld [vmem:[%s4227_s26 + $0x88] sm:$0xf]  ;;  %5920 = vst [vmem:[#allocation21_spill] sm:$0xff] %v4534_v38 }
  0x27   : > { %4006 = vmatprep.subr.msk.bf16.mxu0 %vm740_vm0, %v4339_v43  ;;  %v496_v5 = vsel %vm4272_vm4, %v491_v53, %v495_v34  ;;  %v313_v9 = vrot.slane %v312_v55, 4  ;;  %v322_v12 = vor.u32 %v321_v56, %v317_v50  ;;  %v511_v14 = vshrl.u32 %v4344_v48, 16  ;;  %v4556_v48 = vld [vmem:[%s4227_s26 + $0x5c] sm:$0x1] }
  0x28   : > { %v4368_v19 = vcombine.low %v486_v60, %v496_v5  ;;  %v504_v20 = vor.u32 %v503_v1, %v500_v61  ;;  %v509_v21 = vrot.slane %v507_v2, 5  ;;  %v517_v22 = vshll.u32 %v4352_v58, 16 }
  0x29   : > { %v318_v25 = vsel %vm4272_vm4, %v313_v9, %v317_v50  ;;  %v323_v26 = vrot.slane %v322_v12, 4  ;;  %v513_v28 = vrot.slane %v511_v14, 4  ;;  %v330_v33 = vshrl.u32 %v4358_v3, 16  ;;  %v4413_v9 = vld [vmem:[%s4227_s26 + $0x30] sm:$0xf] }
  0x2a   : > { %5909 = vst [vmem:[#allocation10_spill] sm:$0xff] %v4368_v19  ;;  %3712 = vmatmul.mubr.msk.bf16.vlgmr.msra.gmra.mxu1 %vm691_vm3, %v4368_v19  ;;  %v505_v34 = vrot.slane %v504_v20, 4  ;;  %v519_v35 = vrot.slane %v517_v22, 5  ;;  %v333_v39 = vshll.u32 %v4358_v3, 16  ;;  %v339_v40 = vshll.u32 %v4366_v18, 16 }
  0x2b   : > { %3728 = vmatpush3.bf16.msra.mxu1 %v4230_v4  ;;  %v328_v44 = vsel %vm4272_vm4, %v323_v26, %v327_v57  ;;  %v514_v45 = vor.u32 %v513_v28, %v509_v21  ;;  %v332_v46 = vrot.slane %v330_v33, 4  ;;  %v343_v47 = vshrl.u32 %v4366_v18, 16  ;;  %v4404_v57 = vld [vmem:[%s4227_s26 + $0x8c] sm:$0x1]  ;;  %v4418_v22 = vld [vmem:[%s4227_s26 + $0x34] sm:$0xf] }
  0x2c   : > { %v4396_v50 = vcombine.low %v318_v25, %v328_v44  ;;  %v510_v51 = vsel %vm4272_vm4, %v505_v34, %v509_v21  ;;  %v335_v52 = vrot.slane %v333_v39, 5  ;;  %v341_v53 = vrot.slane %v339_v40, 5  ;;  %4005 = vmatprep.subr.msk.bf16.mxu1 %vm740_vm0, %v4374_v24 }
  0x2d   : > { %v515_v4 = vrot.slane %v514_v45, 4  ;;  %v345_v55 = vrot.slane %v343_v47, 4  ;;  %v349_v56 = vshll.u32 %v4379_v29, 16  ;;  %v522_v60 = vshrl.u32 %v4387_v41, 16 }
  0x2e   : > { %5910 = vst [vmem:[#allocation11_spill] sm:$0xff] %v4396_v50  ;;  %3699 = vmatprep.mubr.msk.bf16.mxu0 %vm691_vm3, %v4396_v50  ;;  %v336_v61 = vor.u32 %v335_v52, %v332_v46  ;;  %v525_v1 = vshll.u32 %v4387_v41, 16  ;;  %v531_v2 = vshll.u32 %v4394_v49, 16  ;;  %v535_v5 = vshrl.u32 %v4394_v49, 16  ;;  %v4429_v46 = vld [vmem:[%s4227_s26 + $0x38] sm:$0x1] }
  0x2f   : > { %v520_v12 = vsel %vm4272_vm4, %v515_v4, %v519_v35  ;;  %v346_v14 = vor.u32 %v345_v55, %v341_v53  ;;  %v351_v20 = vrot.slane %v349_v56, 5  ;;  %v524_v21 = vrot.slane %v522_v60, 4  ;;  %v4434_v52 = vld [vmem:[%s4227_s26 + $0x90] sm:$0xf] }
  0x30   : > { %v4420_v25 = vcombine.low %v510_v51, %v520_v12  ;;  %v337_v26 = vrot.slane %v336_v61, 4  ;;  %v527_v28 = vrot.slane %v525_v1, 5  ;;  %v533_v33 = vrot.slane %v531_v2, 5  ;;  %v4439_v61 = vld [vmem:[%s4227_s26 + $0x94] sm:$0xf] }
  0x31   : > { %v347_v34 = vrot.slane %v346_v14, 4  ;;  %v537_v39 = vrot.slane %v535_v5, 4  ;;  %v541_v40 = vshll.u32 %v4404_v57, 16  ;;  %v354_v44 = vshrl.u32 %v4413_v9, 16 }
  0x32   : > { %5911 = vst [vmem:[#allocation12_spill] sm:$0xff] %v4420_v25  ;;  %3715 = vmatprep.mubr.msk.bf16.mxu1 %vm691_vm3, %v4420_v25  ;;  %v342_v35 = vsel %vm4272_vm4, %v337_v26, %v341_v53  ;;  %v528_v45 = vor.u32 %v527_v28, %v524_v21  ;;  %v357_v47 = vshll.u32 %v4413_v9, 16  ;;  %v363_v51 = vshll.u32 %v4418_v22, 16  ;;  %v4485_v25 = vld [vmem:[%s4227_s26 + $0xa0] sm:$0xf] }
  0x33   : > { %v352_v4 = vsel %vm4272_vm4, %v347_v34, %v351_v20  ;;  %v538_v55 = vor.u32 %v537_v39, %v533_v33  ;;  %v543_v56 = vrot.slane %v541_v40, 5  ;;  %v356_v60 = vrot.slane %v354_v44, 4  ;;  %v4451_v34 = vld [vmem:[%s4227_s26 + $0x98] sm:$0x1]  ;;  %v4456_v44 = vld [vmem:[%s4227_s26 + $0x3c] sm:$0xf] }
  0x34   : > { %v4441_v53 = vcombine.low %v342_v35, %v352_v4  ;;  %v529_v1 = vrot.slane %v528_v45, 4  ;;  %v359_v2 = vrot.slane %v357_v47, 5  ;;  %v365_v5 = vrot.slane %v363_v51, 5  ;;  %v4461_v4 = vld [vmem:[%s4227_s26 + $0x40] sm:$0xf] }
  0x35   : > { %v539_v12 = vrot.slane %v538_v55, 4  ;;  %v367_v14 = vshrl.u32 %v4418_v22, 16  ;;  %v373_v21 = vshll.u32 %v4429_v46, 16  ;;  %v546_v20 = vshrl.u32 %v4434_v52, 16 }
  0x36   : > { %5912 = vst [vmem:[#allocation13_spill] sm:$0xff] %v4441_v53  ;;  %3700 = vmatmul.mubr.msk.bf16.gmra.mxu0 %vm691_vm3, %v4441_v53  ;;  %v534_v26 = vsel %vm4272_vm4, %v529_v1, %v533_v33  ;;  %v360_v28 = vor.u32 %v359_v2, %v356_v60  ;;  %v549_v39 = vshll.u32 %v4434_v52, 16  ;;  %v555_v40 = vshll.u32 %v4439_v61, 16 }
  0x37   : > { %v544_v35 = vsel %vm4272_vm4, %v539_v12, %v543_v56  ;;  %v369_v45 = vrot.slane %v367_v14, 4  ;;  %v375_v47 = vrot.slane %v373_v21, 5  ;;  %v548_v51 = vrot.slane %v546_v20, 4  ;;  %v4473_v14 = vld [vmem:[%s4227_s26 + $0x44] sm:$0x1] }
  0x38   : > { %v4463_v33 = vcombine.low %v534_v26, %v544_v35  ;;  %v361_v55 = vrot.slane %v360_v28, 4  ;;  %v551_v60 = vrot.slane %v549_v39, 5  ;;  %v557_v1 = vrot.slane %v555_v40, 5  ;;  %v4478_v26 = vld [vmem:[%s4227_s26 + $0x9c] sm:$0xf] }
  0x39   : > { %v370_v2 = vor.u32 %v369_v45, %v365_v5  ;;  %v559_v36 = vshrl.u32 %v4439_v61, 16  ;;  %v565_v63 = vshll.u32 %v4451_v34, 16  ;;  %v378_v15 = vshrl.u32 %v4456_v44, 16 }
  0x3a   : > { %5913 = vst [vmem:[#allocation14_spill] sm:$0xff] %v4463_v33  ;;  %3716 = vmatmul.mubr.msk.bf16.gmra.mxu1 %vm691_vm3, %v4463_v33  ;;  %v366_v56 = vsel %vm4272_vm4, %v361_v55, %v365_v5  ;;  %v552_v12 = vor.u32 %v551_v60, %v548_v51  ;;  %v381_v21 = vshll.u32 %v4456_v44, 16  ;;  %v387_v20 = vshll.u32 %v4461_v4, 16 }
  0x3b   : > { %v371_v28 = vrot.slane %v370_v2, 4  ;;  %v561_v39 = vrot.slane %v559_v36, 4  ;;  %v567_v40 = vrot.slane %v565_v63, 5  ;;  %v380_v35 = vrot.slane %v378_v15, 4 }
  0x3c   : > { %v553_v45 = vrot.slane %v552_v12, 4  ;;  %v383_v62 = vrot.slane %v381_v21, 5  ;;  %v389_v33 = vrot.slane %v387_v20, 5  ;;  %v391_v5 = vshrl.u32 %v4461_v4, 16  ;;  %v4493_v21 = vld [vmem:[%s4227_s26 + $0xa4] sm:$0x1] }
  0x3d   : > { %v376_v51 = vsel %vm4272_vm4, %v371_v28, %v375_v47  ;;  %v562_v55 = vor.u32 %v561_v39, %v557_v1  ;;  %v397_v60 = vshll.u32 %v4473_v14, 16  ;;  %v570_v2 = vshrl.u32 %v4478_v26, 16  ;;  %5915 = vst [vmem:[#allocation16_spill] sm:$0xff] %v4493_v21  ;;  %v4496_v20 = vld [vmem:[%s4227_s26 + $0x48] sm:$0xf] }
  0x3e   : > { %v4488_v36 = vcombine.low %v366_v56, %v376_v51  ;;  %v558_v15 = vsel %vm4272_vm4, %v553_v45, %v557_v1  ;;  %v384_v63 = vor.u32 %v383_v62, %v380_v35  ;;  %v393_v12 = vrot.slane %v391_v5, 4 }
  0x3f   : > { %v563_v47 = vrot.slane %v562_v55, 4  ;;  %v399_v28 = vrot.slane %v397_v60, 5  ;;  %v572_v39 = vrot.slane %v570_v2, 4  ;;  %v573_v19 = vshll.u32 %v4478_v26, 16  ;;  %v4507_v55 = vld [vmem:[%s4227_s26 + $0x4c] sm:$0xf] }
  0x40   : > { %5914 = vst [vmem:[#allocation15_spill] sm:$0xff] %v4488_v36  ;;  %3703 = vmatprep.mubr.msk.bf16.mxu0 %vm691_vm3, %v4488_v36  ;;  %v385_v56 = vrot.slane %v384_v63, 4  ;;  %v394_v51 = vor.u32 %v393_v12, %v389_v33  ;;  %v579_v1 = vshll.u32 %v4485_v25, 16  ;;  %v583_v62 = vshrl.u32 %v4485_v25, 16  ;;  %v4515_v36 = vld [vmem:[%s4227_s26 + $0x50] sm:$0x1] }
  0x41   : > { %v568_v35 = vsel %vm4272_vm4, %v563_v47, %v567_v40  ;;  %v575_v45 = vrot.slane %v573_v19, 5  ;;  %v589_v5 = vshll.u32 %v4493_v21, 16  ;;  %v402_v60 = vshrl.u32 %v4496_v20, 16  ;;  %v4518_v47 = vld [vmem:[%s4227_s26 + $0xa8] sm:$0xf] }
  0x42   : > { %v4510_v2 = vcombine.low %v558_v15, %v568_v35  ;;  %v390_v63 = vsel %vm4272_vm4, %v385_v56, %v389_v33  ;;  %v395_v12 = vrot.slane %v394_v51, 4  ;;  %v581_v11 = vrot.slane %v579_v1, 5  ;;  %5917 = vst [vmem:[#allocation18_spill] sm:$0xff] %v4518_v47 }
  0x43   : > { %v576_v53 = vor.u32 %v575_v45, %v572_v39  ;;  %v585_v50 = vrot.slane %v583_v62, 4  ;;  %v591_v40 = vrot.slane %v589_v5, 5  ;;  %v404_v19 = vrot.slane %v402_v60, 4  ;;  %v4531_v45 = vld [vmem:[%s4227_s26 + $0xac] sm:$0xf] }
  0x44   : > { %5916 = vst [vmem:[#allocation17_spill] sm:$0xff] %v4510_v2  ;;  %3719 = vmatprep.mubr.msk.bf16.mxu1 %vm691_vm3, %v4510_v2  ;;  %v400_v15 = vsel %vm4272_vm4, %v395_v12, %v399_v28  ;;  %v405_v33 = vshll.u32 %v4496_v20, 16  ;;  %v411_v56 = vshll.u32 %v4507_v55, 16  ;;  %v415_v51 = vshrl.u32 %v4507_v55, 16  ;;  %5919 = vst [vmem:[#allocation20_spill] sm:$0xff] %v4531_v45 }
  0x45   : > { %v4527_v1 = vcombine.low %v390_v63, %v400_v15  ;;  %v577_v39 = vrot.slane %v576_v53, 4  ;;  %v586_v62 = vor.u32 %v585_v50, %v581_v11  ;;  %v421_v35 = vshll.u32 %v4515_v36, 16 }
  0x46   : > { %v407_v5 = vrot.slane %v405_v33, 5  ;;  %v413_v60 = vrot.slane %v411_v56, 5  ;;  %v417_v2 = vrot.slane %v415_v51, 4  ;;  %v594_v28 = vshrl.u32 %v4518_v47, 16  ;;  %v4544_v51 = vld [vmem:[%s4227_s26 + $0x54] sm:$0xf] }
  0x47   : > { %5918 = vst [vmem:[#allocation19_spill] sm:$0xff] %v4527_v1  ;;  %3704 = vmatmul.mubr.msk.bf16.gmra.mxu0 %vm691_vm3, %v4527_v1  ;;  %v582_v53 = vsel %vm4272_vm4, %v577_v39, %v581_v11  ;;  %v587_v50 = vrot.slane %v586_v62, 4  ;;  %v423_v63 = vrot.slane %v421_v35, 5  ;;  %v597_v12 = vshll.u32 %v4518_v47, 16  ;;  %v4551_v62 = vld [vmem:[%s4227_s26 + $0x58] sm:$0xf] }
  0x48   : > { %v408_v15 = vor.u32 %v407_v5, %v404_v19  ;;  %v418_v58 = vor.u32 %v417_v2, %v413_v60  ;;  %v596_v33 = vrot.slane %v594_v28, 4  ;;  %v603_v56 = vshll.u32 %v4531_v45, 16 }
  0x49   : > { %v592_v1 = vsel %vm4272_vm4, %v587_v50, %v591_v40  ;;  %v599_v37 = vrot.slane %v597_v12, 5  ;;  %v607_v11 = vshrl.u32 %v4531_v45, 16  ;;  %v613_v39 = vshll.u32 %v4534_v38, 16 }
  0x4a   : > { %v4553_v2 = vcombine.low %v582_v53, %v592_v1  ;;  %v409_v19 = vrot.slane %v408_v15, 4  ;;  %v419_v35 = vrot.slane %v418_v58, 4  ;;  %v605_v5 = vrot.slane %v603_v56, 5 }
  0x4b   : > { %v600_v28 = vor.u32 %v599_v37, %v596_v33  ;;  %v609_v0 = vrot.slane %v607_v11, 4  ;;  %v615_v54 = vrot.slane %v613_v39, 5  ;;  %v426_v40 = vshrl.u32 %v4544_v51, 16  ;;  %v4568_v37 = vld [vmem:[%s4227_s26 + $0xb4] sm:$0xf] }
  0x4c   : > { %5921 = vst [vmem:[#allocation22_spill] sm:$0xff] %v4553_v2  ;;  %3720 = vmatmul.mubr.msk.bf16.gmra.mxu1 %vm691_vm3, %v4553_v2  ;;  %v414_v50 = vsel %vm4272_vm4, %v409_v19, %v413_v60  ;;  %v424_v1 = vsel %vm4272_vm4, %v419_v35, %v423_v63  ;;  %v429_v58 = vshll.u32 %v4544_v51, 16  ;;  %v435_v53 = vshll.u32 %v4551_v62, 16  ;;  %5922 = vst [vmem:[#allocation23_spill] sm:$0xff] %v4568_v37  ;;  %v4573_v11 = vld [vmem:[%s4227_s26 + $0xb8] sm:$0xf] }
  0x4d   : > { %v4570_v12 = vcombine.low %v414_v50, %v424_v1  ;;  %v601_v15 = vrot.slane %v600_v28, 4  ;;  %v610_v33 = vor.u32 %v609_v0, %v605_v5  ;;  %v428_v56 = vrot.slane %v426_v40, 4 }
  0x4e   : > { %v431_v39 = vrot.slane %v429_v58, 5  ;;  %v437_v2 = vrot.slane %v435_v53, 5  ;;  %v439_v60 = vshrl.u32 %v4551_v62, 16  ;;  %v445_v63 = vshll.u32 %v4556_v48, 16  ;;  %v4584_v58 = vld [vmem:[%s4227_s26 + $0xbc] sm:$0x1] }
  0x4f   : > { %5923 = vst [vmem:[#allocation24_spill] sm:$0xff] %v4570_v12  ;;  %3707 = vmatprep.mubr.msk.bf16.mxu0 %vm691_vm3, %v4570_v12  ;;  %v606_v19 = vsel %vm4272_vm4, %v601_v15, %v605_v5  ;;  %v611_v35 = vrot.slane %v610_v33, 4  ;;  %v618_v28 = vshrl.u32 %v4568_v37, 16  ;;  %v621_v0 = vshll.u32 %v4568_v37, 16 }
  0x50   : > { %v432_v40 = vor.u32 %v431_v39, %v428_v56  ;;  %v441_v50 = vrot.slane %v439_v60, 4  ;;  %v447_v1 = vrot.slane %v445_v63, 5  ;;  %v627_v53 = vshll.u32 %v4573_v11, 16 }
  0x51   : > { %v616_v38 = vsel %vm4272_vm4, %v611_v35, %v615_v54  ;;  %v620_v47 = vrot.slane %v618_v28, 4  ;;  %v623_v12 = vrot.slane %v621_v0, 5  ;;  %v631_v45 = vshrl.u32 %v4573_v11, 16 }
  0x52   : > { %v4590_v5 = vcombine.low %v606_v19, %v616_v38  ;;  %v433_v15 = vrot.slane %v432_v40, 4  ;;  %v442_v33 = vor.u32 %v441_v50, %v437_v2  ;;  %v629_v21 = vrot.slane %v627_v53, 5 }
  0x53   : > { %v624_v37 = vor.u32 %v623_v12, %v620_v47  ;;  %v633_v56 = vrot.slane %v631_v45, 4  ;;  %v637_v39 = vshll.u32 %v4584_v58, 16  ;;  %v3376_v54 = vrot.slane %v4236_v6, 9 }
  0x54   : > { %3723 = vmatprep.mubr.msk.bf16.mxu1 %vm691_vm3, %v4590_v5  ;;  %v438_v38 = vsel %vm4272_vm4, %v433_v15, %v437_v2  ;;  %v443_v63 = vrot.slane %v442_v33, 4  ;;  %v1218_v47 = vrot.slane %v4239_v7, 5  ;;  %v4607_v45 = vcombine.low %v4265_v30, %v4268_v31 }
  0x55   : > { %v625_v12 = vrot.slane %v624_v37, 4  ;;  %v634_v19 = vor.u32 %v633_v56, %v629_v21  ;;  %v639_v35 = vrot.slane %v637_v39, 5  ;;  %v3377_v28 = vrot.slane %v4265_v30, 9 }
  0x56   : > { %v448_v0 = vsel %vm4272_vm4, %v443_v63, %v447_v1  ;;  %v1219_v40 = vsel %vm4595_vm7, %v3376_v54, %v1218_v47  ;;  %v1220_v50 = vrot.slane %v1218_v47, 4  ;;  %v5926_v2 = vrot.slane %v4268_v31, 5 }
  0x57   : > { %v4616_v15 = vcombine.low %v438_v38, %v448_v0  ;;  %v630_v33 = vsel %vm4272_vm4, %v625_v12, %v629_v21  ;;  %v635_v37 = vrot.slane %v634_v19, 4  ;;  %v5928_v1 = vrot.slane %v4242_v8, 5 }
  0x58   : > { %v1227_v53 = vrot.slane %v5926_v2, 4  ;;  %v5927_v56 = vmov %v5926_v2  ;;  %v5929_v54 = vrot.slane %v4279_v42, 5  ;;  %v4634_v63 = vcombine.low %v4308_v10, %v4317_v23 }
  0x59   : > { %v1226_v30 = vsel %vm4595_vm7, %v3377_v28, %v5927_v56  ;;  %v1222_v39 = vsel %vm4595_vm7, %v1220_v50, %v5928_v1  ;;  %v3378_v21 = vrot.slane %v4308_v10, 9  ;;  %3708 = vmatmul.mubr.msk.bf16.gmra.mxu0 %vm691_vm3, %v4616_v15  ;;  %v640_v8 = vsel %vm4272_vm4, %v635_v37, %v639_v35 }
  0x5a   : > { %v1229_v38 = vsel %vm4595_vm7, %v1227_v53, %v5929_v54  ;;  %v3393_v31 = vcombine.low %v1219_v40, %v1222_v39  ;;  %v1232_v42 = vrot.slane %v4317_v23, 5  ;;  %v4644_v12 = vcombine.low %v630_v33, %v640_v8 }
  0x5b   : > { %v4641_v47 = vcombine.low %v1226_v30, %v1229_v38  ;;  %v1235_v19 = vrot.slane %v4324_v27, 5  ;;  %v1239_v0 = vrot.slane %v4366_v18, 5  ;;  %v3379_v35 = vrot.slane %v4358_v3, 9 }
  0x5c   : > { %5930 = vst [vmem:[#allocation25_spill] sm:$0xff] %v4644_v12  ;;  %3763 = vmatprep.mubr.msk.bf16.mxu0 %vm691_vm3, %v3393_v31  ;;  %v1233_v10 = vsel %vm4595_vm7, %v3378_v21, %v1232_v42  ;;  %v1234_v28 = vrot.slane %v1232_v42, 4  ;;  %3724 = vmatmul.mubr.msk.bf16.gmra.mxu1 %vm691_vm3, %v4644_v12  ;;  %v3380_v40 = vrot.slane %v4413_v9, 9  ;;  %v1246_v23 = vrot.slane %v4418_v22, 5 }
  0x5d   : > { %v5931_v27 = vcombine.low %v4236_v6, %v4239_v7  ;;  %v1241_v2 = vrot.slane %v1239_v0, 4  ;;  %v1242_v53 = vrot.slane %v4379_v29, 5  ;;  %v1249_v33 = vrot.slane %v4429_v46, 5  ;;  %v4679_v46 = vld [vmem:[%s5852_s1 + $0xc] sm:$0x3] }
  0x5e   : > { %v1236_v50 = vsel %vm4595_vm7, %v1234_v28, %v1235_v19  ;;  %v1248_v56 = vrot.slane %v1246_v23, 4  ;;  %v1861_v30 = vsel %vm740_vm0, %v4339_v43, 0  ;;  %v1253_v1 = vrot.slane %v4461_v4, 5  ;;  %v4696_v19 = vld [vmem:[%s5852_s1 + $0xa] sm:$0x3] }
  0x5f   : > { %3729 = vmatprep.mubr.msk.bf16.mxu1 %vm691_vm3, %v5931_v27  ;;  %v4664_v37 = vcombine.low %v1233_v10, %v1236_v50  ;;  %v1633_v6 = vsel %vm740_vm0, %v4374_v24, 0  ;;  %v1240_v7 = vsel %vm4595_vm7, %v3379_v35, %v1239_v0  ;;  %v1247_v39 = vsel %vm4595_vm7, %v3380_v40, %v1246_v23 }
  0x60   : > { %v1260_v29 = vrot.slane %v4507_v55, 5  ;;  %v1243_v43 = vsel %vm4595_vm7, %v1241_v2, %v1242_v53  ;;  %v1250_v24 = vsel %vm4595_vm7, %v1248_v56, %v1249_v33  ;;  %v3381_v54 = vrot.slane %v4456_v44, 9 }
  0x61   : > { %3764 = vmatmul.mubr.msk.bf16.vlgmr.msra.gmra.mxu0 %vm691_vm3, %v4641_v47  ;;  %v1256_v38 = vrot.slane %v4473_v14, 5  ;;  %v1255_v21 = vrot.slane %v1253_v1, 4  ;;  %v3382_v8 = vrot.slane %v4496_v20, 9  ;;  %v1263_v42 = vrot.slane %v4515_v36, 5 }
  0x62   : > { %3830 = vmatpush3.bf16.msra.mxu0 %v1861_v30  ;;  %3767 = vmatprep.mubr.msk.bf16.mxu0 %vm691_vm3, %v4664_v37  ;;  %v1262_v31 = vrot.slane %v1260_v29, 4  ;;  %v4704_v14 = vcombine.low %v1240_v7, %v1243_v43  ;;  %v4706_v10 = vcombine.low %v1247_v39, %v1250_v24  ;;  %v1254_v36 = vsel %vm4595_vm7, %v3381_v54, %v1253_v1 }
  0x63   : > { %4008 = vmatprep.subr.msk.bf16.mxu0 %vm740_vm0, %v4679_v46  ;;  %v1257_v28 = vsel %vm4595_vm7, %v1255_v21, %v1256_v38  ;;  %v1261_v0 = vsel %vm4595_vm7, %v3382_v8, %v1260_v29  ;;  %v1267_v40 = vrot.slane %v4551_v62, 5  ;;  %v1277_v23 = vrot.slane %v4257_v17, 5  ;;  %v5932_v8 = vld [vmem:[#allocation16_spill] sm:$0xff] }
  0x64   : > { %3730 = vmatmul.mubr.msk.bf16.vlgmr.msra.gmra.mxu1 %vm691_vm3, %v4607_v45  ;;  %v1264_v35 = vsel %vm4595_vm7, %v1262_v31, %v1263_v42  ;;  %v3383_v27 = vrot.slane %v4544_v51, 9  ;;  %v3384_v50 = vrot.slane %v4249_v13, 9  ;;  %v1274_v2 = vrot.slane %v4254_v16, 5  ;;  %v5933_v42 = vld [vmem:[#allocation20_spill] sm:$0xff] }
  0x65   : > { %3796 = vmatpush3.bf16.msra.mxu1 %v1633_v6  ;;  %3733 = vmatprep.mubr.msk.bf16.mxu1 %vm691_vm3, %v4634_v63  ;;  %v4725_v53 = vcombine.low %v4358_v3, %v4366_v18  ;;  %v4729_v33 = vcombine.low %v4413_v9, %v4418_v22  ;;  %v4733_v56 = vcombine.low %v4456_v44, %v4461_v4  ;;  %v1270_v3 = vrot.slane %v4556_v48, 5 }
  0x66   : > { %4007 = vmatprep.subr.msk.bf16.mxu1 %vm740_vm0, %v4696_v19  ;;  %v4737_v17 = vcombine.low %v4496_v20, %v4507_v55  ;;  %v4741_v30 = vcombine.low %v1254_v36, %v1257_v28  ;;  %v4743_v1 = vcombine.low %v1261_v0, %v1264_v35  ;;  %v4748_v18 = vcombine.low %v4387_v41, %v4394_v49  ;;  %v5934_v36 = vld [vmem:[#allocation18_spill] sm:$0xff] }
  0x67   : > { %v1269_v9 = vrot.slane %v1267_v40, 4  ;;  %v3387_v22 = vrot.slane %v4387_v41, 9  ;;  %v1295_v44 = vrot.slane %v4394_v49, 5  ;;  %v1298_v4 = vrot.slane %v4404_v57, 5 }
  0x68   : > { %v1268_v20 = vsel %vm4595_vm7, %v3383_v27, %v1267_v40  ;;  %v1275_v48 = vsel %vm4595_vm7, %v3384_v50, %v1274_v2  ;;  %v1276_v55 = vrot.slane %v1274_v2, 4  ;;  %v4761_v6 = vcombine.low %v4434_v52, %v4439_v61  ;;  %v5935_v40 = vld [vmem:[#allocation21_spill] sm:$0xff] }
  0x69   : > { %3768 = vmatmul.mubr.msk.bf16.gmra.mxu0 %vm691_vm3, %v4704_v14  ;;  %v1296_v41 = vsel %vm4595_vm7, %v3387_v22, %v1295_v44  ;;  %v1297_v49 = vrot.slane %v1295_v44, 4  ;;  %v3388_v57 = vrot.slane %v4434_v52, 9  ;;  %v1302_v7 = vrot.slane %v4439_v61, 5 }
  0x6a   : > { %3771 = vmatprep.mubr.msk.bf16.mxu0 %vm691_vm3, %v4706_v10  ;;  %v1281_v39 = vrot.slane %v4294_v59, 5  ;;  %v1305_v29 = vrot.slane %v4451_v34, 5  ;;  %v4775_v43 = vcombine.low %v4478_v26, %v4485_v25  ;;  %v3389_v24 = vrot.slane %v4478_v26, 9 }
  0x6b   : > { %v1271_v54 = vsel %vm4595_vm7, %v1269_v9, %v1270_v3  ;;  %v1299_v52 = vsel %vm4595_vm7, %v1297_v49, %v1298_v4  ;;  %v1303_v61 = vsel %vm4595_vm7, %v3388_v57, %v1302_v7  ;;  %v1304_v38 = vrot.slane %v1302_v7, 4  ;;  %v5936_v3 = vld [vmem:[#allocation23_spill] sm:$0xff]  ;;  %v5937_v57 = vld [vmem:[#allocation8_spill] sm:$0xff] }
  0x6c   : > { %3734 = vmatmul.mubr.msk.bf16.gmra.mxu1 %vm691_vm3, %v4725_v53  ;;  %v4784_v21 = vcombine.low %v1296_v41, %v1299_v52  ;;  %v1309_v34 = vrot.slane %v4485_v25, 5  ;;  %v1312_v31 = vrot.slane %v5932_v8, 5  ;;  %v4790_v28 = vcombine.low %v5934_v36, %v5933_v42 }
  0x6d   : > { %3737 = vmatprep.mubr.msk.bf16.mxu1 %vm691_vm3, %v4729_v33  ;;  %v1306_v26 = vsel %vm4595_vm7, %v1304_v38, %v1305_v29  ;;  %v3390_v0 = vrot.slane %v5934_v36, 9  ;;  %v1316_v35 = vrot.slane %v5933_v42, 5  ;;  %v1319_v27 = vrot.slane %v5935_v40, 5  ;;  %v5939_v42 = vld [vmem:[#allocation4_spill] sm:$0xff] }
  0x6e   : > { %v4799_v50 = vcombine.low %v1303_v61, %v1306_v26  ;;  %v1310_v25 = vsel %vm4595_vm7, %v3389_v24, %v1309_v34  ;;  %v1311_v2 = vrot.slane %v1309_v34, 4  ;;  %v4805_v9 = vcombine.low %v5936_v3, %v4573_v11 }
  0x6f   : > { %v1317_v22 = vsel %vm4595_vm7, %v3390_v0, %v1316_v35  ;;  %v1318_v44 = vrot.slane %v1316_v35, 4  ;;  %v3391_v4 = vrot.slane %v5936_v3, 9  ;;  %v1323_v41 = vrot.slane %v4573_v11, 5  ;;  %v5940_v0 = vld [vmem:[#allocation6_spill] sm:$0xff] }
  0x70   : > { %v1278_v49 = vsel %vm4595_vm7, %v1276_v55, %v1277_v23  ;;  %v1288_v7 = vrot.slane %v5937_v57, 5  ;;  %v1313_v29 = vsel %vm4595_vm7, %v1311_v2, %v1312_v31  ;;  %v1326_v24 = vrot.slane %v4584_v58, 5  ;;  %v5938_v55 = vld [vmem:[#allocation3_spill] sm:$0xff] }
  0x71   : > { %3772 = vmatmul.mubr.msk.bf16.gmra.mxu0 %vm691_vm3, %v4741_v30  ;;  %v4821_v52 = vcombine.low %v1310_v25, %v1313_v29  ;;  %v1320_v61 = vsel %vm4595_vm7, %v1318_v44, %v1319_v27  ;;  %v1324_v11 = vsel %vm4595_vm7, %v3391_v4, %v1323_v41  ;;  %v1325_v38 = vrot.slane %v1323_v41, 4  ;;  %v5941_v27 = vld [vmem:[#allocation9_spill] sm:$0xff]  ;;  %v4908_v4 = vld [vmem:[%s4227_s26 + $0xc0] sm:$0xf]  ;;  %v249_v41 = vld [vmem:[%s4227_s26 + $0xc8] sm:$0x1] }
  0x72   : > { %3775 = vmatprep.mubr.msk.bf16.mxu0 %vm691_vm3, %v4743_v1  ;;  %v4829_v23 = vcombine.low %v1268_v20, %v1271_v54  ;;  %v3385_v34 = vrot.slane %v5938_v55, 9  ;;  %v4832_v58 = vcombine.low %v1317_v22, %v1320_v61  ;;  %v4834_v8 = vcombine.low %v1275_v48, %v1278_v49  ;;  %v5942_v61 = vld [vmem:[#allocation7_spill] sm:$0xff] }
  0x73   : > { %v1283_v31 = vrot.slane %v1281_v39, 4  ;;  %v1284_v36 = vrot.slane %v5939_v42, 5  ;;  %v1327_v26 = vsel %vm4595_vm7, %v1325_v38, %v1326_v24  ;;  %v3386_v35 = vrot.slane %v5940_v0, 9  ;;  %v5944_v42 = vld [vmem:[#allocation13_spill] sm:$0xff] }
  0x74   : > { %3738 = vmatmul.mubr.msk.bf16.gmra.mxu1 %vm691_vm3, %v4733_v56  ;;  %v1290_v40 = vrot.slane %v1288_v7, 4  ;;  %v1291_v25 = vrot.slane %v5941_v27, 5  ;;  %v4841_v2 = vcombine.low %v1324_v11, %v1327_v26  ;;  %v4845_v20 = vcombine.low %v4544_v51, %v4551_v62  ;;  %v5948_v26 = vld [vmem:[#allocation5_spill] sm:$0xff] }
  0x75   : > { %3741 = vmatprep.mubr.msk.bf16.mxu1 %vm691_vm3, %v4737_v17  ;;  %v4851_v48 = vcombine.low %v4249_v13, %v4254_v16  ;;  %v1282_v54 = vsel %vm4595_vm7, %v3385_v34, %v1281_v39  ;;  %v1285_v3 = vsel %vm4595_vm7, %v1283_v31, %v1284_v36  ;;  %v1289_v51 = vsel %vm4595_vm7, %v3386_v35, %v1288_v7  ;;  %v5943_v34 = vld [vmem:[#allocation11_spill] sm:$0xff]  ;;  %v5947_v36 = vld [vmem:[#allocation24_spill] sm:$0xff] }
  0x76   : > { %v1292_v62 = vsel %vm4595_vm7, %v1290_v40, %v1291_v25  ;;  %v4867_v13 = vcombine.low %v1282_v54, %v1285_v3  ;;  %v4873_v39 = vcombine.low %v5938_v55, %v4294_v59  ;;  %v4879_v22 = vcombine.low %v5940_v0, %v5937_v57  ;;  %v4902_v59 = vld [vmem:[%s4227_s26 + $0xc4] sm:$0xf]  ;;  %v3517_v55 = vld [vmem:[%s5852_s1 + $0x10] sm:$0x3] }
  0x77   : > { %v4869_v16 = vcombine.low %v1289_v51, %v1292_v62  ;;  %v2059_v44 = vrot.slane %v4902_v59, 5  ;;  %v3461_v49 = vrot.slane %v4908_v4, 9  ;;  %v2062_v7 = vrot.slane %v249_v41, 5  ;;  %v5949_v0 = vld [vmem:[#allocation10_spill] sm:$0xff]  ;;  %v5950_v35 = vld [vmem:[#allocation12_spill] sm:$0xff] }
  0x78   : > { %v2279_v38 = vsel %vm740_vm0, %v4679_v46, 0  ;;  %v2073_v31 = vsel %vm740_vm0, %v4696_v19, 0  ;;  %v5945_v46 = vld [vmem:[#allocation15_spill] sm:$0xff]  ;;  %v5951_v40 = vld [vmem:[#allocation14_spill] sm:$0xff]  ;;  %v1829_v27 = vshrl.u32 %v4908_v4, 16  ;;  %v1832_v25 = vshll.u32 %v4908_v4, 16 }
  0x79   : > { %3776 = vmatmul.mubr.msk.bf16.gmra.mxu0 %vm691_vm3, %v4829_v23  ;;  %v2061_v57 = vrot.slane %v2059_v44, 4  ;;  %v2060_v29 = vsel %vm4595_vm7, %v3461_v49, %v2059_v44  ;;  %v5946_v19 = vld [vmem:[#allocation19_spill] sm:$0xff]  ;;  %v1842_v54 = vshrl.u32 %v4902_v59, 16  ;;  %v1838_v3 = vshll.u32 %v4902_v59, 16 }
  0x7a   : > { %3779 = vmatprep.mubr.msk.bf16.mxu0 %vm691_vm3, %v4834_v8  ;;  %v1831_v51 = vrot.slane %v1829_v27, 4  ;;  %v1834_v62 = vrot.slane %v1832_v25, 5 }
  0x7b   : > { %v2063_v24 = vsel %vm4595_vm7, %v2061_v57, %v2062_v7  ;;  %v1840_v44 = vrot.slane %v1838_v3, 5  ;;  %v1844_v49 = vrot.slane %v1842_v54, 4  ;;  %v5952_v57 = vld [vmem:[#allocation17_spill] sm:$0xff]  ;;  %v5953_v7 = vld [vmem:[#allocation22_spill] sm:$0xff]  ;;  %v3426_v3 = vcombine.low %v4908_v4, %v4902_v59 }
  0x7c   : > { %3742 = vmatmul.mubr.msk.bf16.gmra.mxu1 %vm691_vm3, %v4845_v20  ;;  %v4920_v11 = vcombine.low %v2060_v29, %v2063_v24  ;;  %v1835_v29 = vor.u32 %v1834_v62, %v1831_v51  ;;  %v2719_v51 = vsel %vm740_vm0, %v3517_v55, 0 }
  0x7d   : > { %3745 = vmatprep.mubr.msk.bf16.mxu1 %vm691_vm3, %v4851_v48  ;;  %v1845_v24 = vor.u32 %v1844_v49, %v1840_v44 }
  0x81   : > { %3780 = vmatmul.mubr.msk.bf16.gmra.mxu0 %vm691_vm3, %v4867_v13 }
  0x82   : > { %3783 = vmatprep.mubr.msk.bf16.mxu0 %vm691_vm3, %v4869_v16 }
  0x84   : > { %3746 = vmatmul.mubr.msk.bf16.gmra.mxu1 %vm691_vm3, %v4873_v39 }
  0x85   : > { %3749 = vmatprep.mubr.msk.bf16.mxu1 %vm691_vm3, %v4879_v22 }
  0x89   : > { %3784 = vmatmul.mubr.msk.bf16.gmra.mxu0 %vm691_vm3, %v4784_v21 }
  0x8a   : > { %3787 = vmatprep.mubr.msk.bf16.mxu0 %vm691_vm3, %v4799_v50 }
  0x8c   : > { %3750 = vmatmul.mubr.msk.bf16.gmra.mxu1 %vm691_vm3, %v4748_v18 }
  0x8d   : > { %3753 = vmatprep.mubr.msk.bf16.mxu1 %vm691_vm3, %v4761_v6 }
  0x91   : > { %3788 = vmatmul.mubr.msk.bf16.gmra.mxu0 %vm691_vm3, %v4821_v52 }
  0x92   : > { %3791 = vmatprep.mubr.msk.bf16.mxu0 %vm691_vm3, %v4832_v58 }
  0x94   : > { %3754 = vmatmul.mubr.msk.bf16.gmra.mxu1 %vm691_vm3, %v4775_v43 }
  0x95   : > { %3757 = vmatprep.mubr.msk.bf16.mxu1 %vm691_vm3, %v4790_v28 }
  0x99   : > { %3792 = vmatmul.mubr.msk.bf16.gmra.mxu0 %vm691_vm3, %v4841_v2 }
  0x9a   : > { %3831 = vmatprep.mubr.msk.bf16.mxu0 %vm691_vm3, %v5942_v61  ;;  %v1848_v61 = vshll.u32 %v249_v41, 16 }
  0x9c   : > { %3758 = vmatmul.mubr.msk.bf16.gmra.mxu1 %vm691_vm3, %v4805_v9  ;;  %v1850_v27 = vrot.slane %v1848_v61, 5  ;;  %v5112_v61 = vld [vmem:[%s4227_s26 + $0xd0] sm:$0xf] }
  0x9d   : > { %3797 = vmatprep.mubr.msk.bf16.mxu1 %vm691_vm3, %v4607_v45  ;;  %v3498_v45 = vld [vmem:[%s5852_s1 + $0xe] sm:$0x3] }
  0x9e   : > { %v2507_v62 = vsel %vm740_vm0, %v3498_v45, 0 }
  0xa1   : > { %3832 = vmatmul.mubr.msk.bf16.vlgmr.msra.gmra.mxu0 %vm691_vm3, %v5943_v34 }
  0xa2   : > { %3898 = vmatpush3.bf16.msra.mxu0 %v2279_v38  ;;  %3835 = vmatprep.mubr.msk.bf16.mxu0 %vm691_vm3, %v5944_v42  ;;  %v1836_v38 = vrot.slane %v1835_v29, 4 }
  0xa3   : > { %4010 = vmatprep.subr.msk.bf16.mxu0 %vm740_vm0, %v3517_v55 }
  0xa4   : > { %3798 = vmatmul.mubr.msk.bf16.vlgmr.msra.gmra.mxu1 %vm691_vm3, %v4634_v63  ;;  %v1841_v25 = vsel %vm4272_vm4, %v1836_v38, %v1840_v44 }
  0xa5   : > { %3864 = vmatpush3.bf16.msra.mxu1 %v2073_v31  ;;  %3801 = vmatprep.mubr.msk.bf16.mxu1 %vm691_vm3, %v4725_v53  ;;  %v1846_v31 = vrot.slane %v1845_v24, 4 }
  0xa6   : > { %4009 = vmatprep.subr.msk.bf16.mxu1 %vm740_vm0, %v3498_v45 }
  0xa7   : > { %v1851_v41 = vsel %vm4272_vm4, %v1846_v31, %v1850_v27 }
  0xa8   : > { %v5002_v54 = vcombine.low %v1841_v25, %v1851_v41 }
  0xa9   : > { %3836 = vmatmul.mubr.msk.bf16.gmra.mxu0 %vm691_vm3, %v5945_v46 }
  0xaa   : > { %3839 = vmatprep.mubr.msk.bf16.mxu0 %vm691_vm3, %v5946_v19  ;;  %5954 = vst [vmem:[#allocation16_spill] sm:$0xff] %v5002_v54 }
  0xac   : > { %3802 = vmatmul.mubr.msk.bf16.gmra.mxu1 %vm691_vm3, %v4729_v33 }
  0xad   : > { %3805 = vmatprep.mubr.msk.bf16.mxu1 %vm691_vm3, %v4733_v56 }
  0xb1   : > { %3840 = vmatmul.mubr.msk.bf16.gmra.mxu0 %vm691_vm3, %v5947_v36 }
  0xb2   : > { %3843 = vmatprep.mubr.msk.bf16.mxu0 %vm691_vm3, %v4616_v15 }
  0xb4   : > { %3806 = vmatmul.mubr.msk.bf16.gmra.mxu1 %vm691_vm3, %v4737_v17 }
  0xb5   : > { %3809 = vmatprep.mubr.msk.bf16.mxu1 %vm691_vm3, %v4845_v20 }
  0xb9   : > { %3844 = vmatmul.mubr.msk.bf16.gmra.mxu0 %vm691_vm3, %v5948_v26 }
  0xba   : > { %3847 = vmatprep.mubr.msk.bf16.mxu0 %vm691_vm3, %v5949_v0 }
  0xbc   : > { %3810 = vmatmul.mubr.msk.bf16.gmra.mxu1 %vm691_vm3, %v4851_v48 }
  0xbd   : > { %3813 = vmatprep.mubr.msk.bf16.mxu1 %vm691_vm3, %v4873_v39 }
  0xc1   : > { %3848 = vmatmul.mubr.msk.bf16.gmra.mxu0 %vm691_vm3, %v5950_v35 }
  0xc2   : > { %3851 = vmatprep.mubr.msk.bf16.mxu0 %vm691_vm3, %v5951_v40 }
  0xc4   : > { %3814 = vmatmul.mubr.msk.bf16.gmra.mxu1 %vm691_vm3, %v4879_v22 }
  0xc5   : > { %3817 = vmatprep.mubr.msk.bf16.mxu1 %vm691_vm3, %v4748_v18 }
  0xc9   : > { %3852 = vmatmul.mubr.msk.bf16.gmra.mxu0 %vm691_vm3, %v5952_v57 }
  0xca   : > { %3855 = vmatprep.mubr.msk.bf16.mxu0 %vm691_vm3, %v5953_v7 }
  0xcc   : > { %3818 = vmatmul.mubr.msk.bf16.gmra.mxu1 %vm691_vm3, %v4761_v6 }
  0xcd   : > { %3821 = vmatprep.mubr.msk.bf16.mxu1 %vm691_vm3, %v4775_v43 }
  0xd1   : > { %3856 = vmatmul.mubr.msk.bf16.gmra.mxu0 %vm691_vm3, %v4590_v5 }
  0xd2   : > { %3859 = vmatprep.mubr.msk.bf16.mxu0 %vm691_vm3, %v4644_v12 }
  0xd4   : > { %3822 = vmatmul.mubr.msk.bf16.gmra.mxu1 %vm691_vm3, %v4790_v28 }
  0xd5   : > { %3825 = vmatprep.mubr.msk.bf16.mxu1 %vm691_vm3, %v4805_v9 }
  0xd9   : > { %3860 = vmatmul.mubr.msk.bf16.gmra.mxu0 %vm691_vm3, %v5002_v54 }
  0xda   : > { %3899 = vmatprep.mubr.msk.bf16.mxu0 %vm691_vm3, %v4634_v63 }
  0xdc   : > { %3826 = vmatmul.mubr.msk.bf16.gmra.mxu1 %vm691_vm3, %v3426_v3 }
  0xdd   : > { %3865 = vmatprep.mubr.msk.bf16.mxu1 %vm691_vm3, %v4641_v47 }
  0xe1   : > { %3900 = vmatmul.mubr.msk.bf16.vlgmr.msra.gmra.mxu0 %vm691_vm3, %v4725_v53 }
  0xe2   : > { %3966 = vmatpush3.bf16.msra.mxu0 %v2719_v51  ;;  %3903 = vmatprep.mubr.msk.bf16.mxu0 %vm691_vm3, %v4729_v33 }
  0xe4   : > { %3866 = vmatmul.mubr.msk.bf16.vlgmr.msra.gmra.mxu1 %vm691_vm3, %v4664_v37 }
  0xe5   : > { %3932 = vmatpush3.bf16.msra.mxu1 %v2507_v62  ;;  %3869 = vmatprep.mubr.msk.bf16.mxu1 %vm691_vm3, %v4704_v14  ;;  %v5025_v63 = vpop.f32.mrf.mxu0 }
  0xe7   : > { %v5035_v53 = vpop.f32.mrf.mxu0 }
  0xe9   : > { %3904 = vmatmul.mubr.msk.bf16.gmra.mxu0 %vm691_vm3, %v4733_v56  ;;  %v5041_v56 = vpop.f32.mrf.mxu0 }
  0xea   : > { %3907 = vmatprep.mubr.msk.bf16.mxu0 %vm691_vm3, %v4737_v17  ;;  %v5031_v47 = vpop.f32.mrf.mxu1 }
  0xeb   : > { %v5051_v59 = vpop.f32.mrf.mxu0 }
  0xec   : > { %3870 = vmatmul.mubr.msk.bf16.gmra.mxu1 %vm691_vm3, %v4706_v10  ;;  %v5037_v33 = vpop.f32.mrf.mxu1 }
  0xed   : > { %3873 = vmatprep.mubr.msk.bf16.mxu1 %vm691_vm3, %v4741_v30 }
  0xee   : > { %v5047_v17 = vpop.f32.mrf.mxu1 }
  0xf0   : > { %v5053_v4 = vpop.f32.mrf.mxu1 }
  0xf1   : > { %3908 = vmatmul.mubr.msk.bf16.gmra.mxu0 %vm691_vm3, %v4845_v20 }
  0xf2   : > { %3911 = vmatprep.mubr.msk.bf16.mxu0 %vm691_vm3, %v4851_v48 }
  0xf4   : > { %3874 = vmatmul.mubr.msk.bf16.gmra.mxu1 %vm691_vm3, %v4743_v1 }
  0xf5   : > { %3877 = vmatprep.mubr.msk.bf16.mxu1 %vm691_vm3, %v4829_v23 }
  0xf6   : > { %v5057_v20 = vpop.f32.mrf.mxu0 }
  0xf8   : > { %v5067_v55 = vpop.f32.mrf.mxu0 }
  0xf9   : > { %3912 = vmatmul.mubr.msk.bf16.gmra.mxu0 %vm691_vm3, %v4873_v39 }
  0xfa   : > { %3915 = vmatprep.mubr.msk.bf16.mxu0 %vm691_vm3, %v4879_v22  ;;  %v5063_v48 = vpop.f32.mrf.mxu1  ;;  %v5073_v39 = vpop.f32.mrf.mxu0 }
  0xfc   : > { %3878 = vmatmul.mubr.msk.bf16.gmra.mxu1 %vm691_vm3, %v4834_v8  ;;  %v5069_v45 = vpop.f32.mrf.mxu1  ;;  %v5083_v44 = vpop.f32.mrf.mxu0 }
  0xfd   : > { %3881 = vmatprep.mubr.msk.bf16.mxu1 %vm691_vm3, %v4867_v13 }
  0xfe   : > { %v5079_v22 = vpop.f32.mrf.mxu1 }
 0x100   : > { %v5085_v49 = vpop.f32.mrf.mxu1 }
 0x101   : > { %3916 = vmatmul.mubr.msk.bf16.gmra.mxu0 %vm691_vm3, %v4748_v18 }
 0x102   : > { %3919 = vmatprep.mubr.msk.bf16.mxu0 %vm691_vm3, %v4761_v6 }
 0x104   : > { %3882 = vmatmul.mubr.msk.bf16.gmra.mxu1 %vm691_vm3, %v4869_v16 }
 0x105   : > { %3885 = vmatprep.mubr.msk.bf16.mxu1 %vm691_vm3, %v4784_v21 }
 0x107   : > { %v5089_v18 = vpop.f32.mrf.mxu0 }
 0x109   : > { %3920 = vmatmul.mubr.msk.bf16.gmra.mxu0 %vm691_vm3, %v4775_v43  ;;  %v5099_v29 = vpop.f32.mrf.mxu0 }
 0x10a   : > { %3923 = vmatprep.mubr.msk.bf16.mxu0 %vm691_vm3, %v4790_v28  ;;  %v5109_v28 = vld [vmem:[%s4227_s26 + $0xcc] sm:$0xf] }
 0x10b   : > { %v5105_v43 = vpop.f32.mrf.mxu0 }
 0x10c   : > { %3886 = vmatmul.mubr.msk.bf16.gmra.mxu1 %vm691_vm3, %v4799_v50  ;;  %v5095_v6 = vpop.f32.mrf.mxu1 }
 0x10d   : > { %5955 = vst [vmem:[#allocation20_spill] sm:$0xff] %v5095_v6  ;;  %3889 = vmatprep.mubr.msk.bf16.mxu1 %vm691_vm3, %v4821_v52  ;;  %v5118_v31 = vpop.f32.mrf.mxu0 }
 0x10e   : > { %v5101_v24 = vpop.f32.mrf.mxu1 }
 0x10f   : > { %5956 = vst [vmem:[#allocation18_spill] sm:$0xff] %v5101_v24 }
 0x110   : > { %v5116_v38 = vpop.f32.mrf.mxu1 }
 0x111   : > { %3924 = vmatmul.mubr.msk.bf16.gmra.mxu0 %vm691_vm3, %v4805_v9  ;;  %5957 = vst [vmem:[#allocation21_spill] sm:$0xff] %v5116_v38  ;;  %v3481_v9 = vcombine.low %v5109_v28, %v5112_v61 }
 0x112   : > { %3927 = vmatprep.mubr.msk.bf16.mxu0 %vm691_vm3, %v3426_v3  ;;  %v5124_v27 = vpop.f32.mrf.mxu1 }
 0x113   : > { %5958 = vst [vmem:[#allocation23_spill] sm:$0xff] %v5124_v27 }
 0x114   : > { %3890 = vmatmul.mubr.msk.bf16.gmra.mxu1 %vm691_vm3, %v4832_v58 }
 0x115   : > { %3893 = vmatprep.mubr.msk.bf16.mxu1 %vm691_vm3, %v4841_v2 }
 0x119   : > { %v5126_v25 = vpop.f32.mrf.mxu0  ;;  %3928 = vmatmul.mubr.msk.bf16.gmra.mxu0 %vm691_vm3, %v3481_v9 }
 0x11a   : > { %3967 = vmatprep.mubr.msk.bf16.mxu0 %vm691_vm3, %v4664_v37 }
 0x11b   : > { %v5131_v41 = vpop.f32.mrf.mxu0 }
 0x11c   : > { %v5133_v3 = vpop.f32.mrf.mxu1  ;;  %3894 = vmatmul.mubr.msk.bf16.gmra.mxu1 %vm691_vm3, %v4920_v11 }
 0x11d   : > { %5959 = vst [vmem:[#allocation8_spill] sm:$0xff] %v5133_v3  ;;  %v5137_v51 = vpop.f32.mrf.mxu0  ;;  %3933 = vmatprep.mubr.msk.bf16.mxu1 %vm691_vm3, %v5943_v34 }
 0x11e   : > { %v5141_v62 = vpop.f32.mrf.mxu1 }
 0x11f   : > { %5960 = vst [vmem:[#allocation3_spill] sm:$0xff] %v5141_v62  ;;  %v5143_v27 = vpop.f32.mrf.mxu0 }
 0x120   : > { %v5145_v9 = vpop.f32.mrf.mxu1 }
 0x121   : > { %5961 = vst [vmem:[#allocation4_spill] sm:$0xff] %v5145_v9  ;;  %v3765_v38 = vpop.f32.mrf.mxu0  ;;  %3968 = vmatmul.mubr.msk.bf16.vlgmr.msra.gmra.mxu0 %vm691_vm3, %v4704_v14 }
 0x122   : > { %v5149_v37 = vpop.f32.mrf.mxu1  ;;  %3971 = vmatprep.mubr.msk.bf16.mxu0 %vm691_vm3, %v4706_v10 }
 0x123   : > { %5962 = vst [vmem:[#allocation6_spill] sm:$0xff] %v5149_v37  ;;  %v1463_v3 = vpop.f32.mrf.mxu0 }
 0x124   : > { %v3731_v24 = vpop.f32.mrf.mxu1  ;;  %3934 = vmatmul.mubr.msk.bf16.vlgmr.msra.gmra.mxu1 %vm691_vm3, %v5944_v42 }
 0x125   : > { %v1079_v34 = vadd.f32 %v3731_v24, %v5025_v63  ;;  %v3766_v62 = vpop.f32.mrf.mxu0  ;;  %3937 = vmatprep.mubr.msk.bf16.mxu1 %vm691_vm3, %v5945_v46 }
 0x126   : > { %v1070_v9 = vpop.f32.mrf.mxu1 }
 0x127   : > { %v5158_v54 = vadd.f32 %v3765_v38, %v1079_v34  ;;  %v1071_v14 = vadd.f32 %v1070_v9, %v5035_v53  ;;  %v1466_v37 = vpop.f32.mrf.mxu0 }
 0x128   : > { %v3732_v6 = vpop.f32.mrf.mxu1 }
 0x129   : > { %v5161_v32 = vadd.f32 %v1463_v3, %v1071_v14  ;;  %v1082_v10 = vadd.f32 %v3732_v6, %v5041_v56  ;;  %v3769_v12 = vpop.f32.mrf.mxu0  ;;  %3972 = vmatmul.mubr.msk.bf16.gmra.mxu0 %vm691_vm3, %v4741_v30 }
 0x12a   : > { %v1073_v42 = vpop.f32.mrf.mxu1  ;;  %3975 = vmatprep.mubr.msk.bf16.mxu0 %vm691_vm3, %v4743_v1 }
 0x12b   : > { %v5168_v46 = vadd.f32 %v3766_v62, %v1082_v10  ;;  %v1074_v63 = vadd.f32 %v1073_v42, %v5051_v59  ;;  %v1479_v24 = vpop.f32.mrf.mxu0 }
 0x12c   : > { %v3735_v53 = vpop.f32.mrf.mxu1  ;;  %3938 = vmatmul.mubr.msk.bf16.gmra.mxu1 %vm691_vm3, %v5946_v19 }
 0x12d   : > { %v5173_v38 = vadd.f32 %v1466_v37, %v1074_v63  ;;  %v1095_v56 = vadd.f32 %v3735_v53, %v5057_v20  ;;  %v3770_v6 = vpop.f32.mrf.mxu0  ;;  %3941 = vmatprep.mubr.msk.bf16.mxu1 %vm691_vm3, %v5947_v36 }
 0x12e   : > { %v1086_v30 = vpop.f32.mrf.mxu1 }
 0x12f   : > { %v5178_v3 = vadd.f32 %v3769_v12, %v1095_v56  ;;  %v1087_v1 = vadd.f32 %v1086_v30, %v5067_v55  ;;  %v1482_v62 = vpop.f32.mrf.mxu0 }
 0x130   : > { %v3736_v59 = vpop.f32.mrf.mxu1 }
 0x131   : > { %v5181_v9 = vadd.f32 %v1479_v24, %v1087_v1  ;;  %v1098_v34 = vadd.f32 %v3736_v59, %v5073_v39  ;;  %v3773_v19 = vpop.f32.mrf.mxu0  ;;  %3976 = vmatmul.mubr.msk.bf16.gmra.mxu0 %vm691_vm3, %v4829_v23 }
 0x132   : > { %v1089_v20 = vpop.f32.mrf.mxu1  ;;  %3979 = vmatprep.mubr.msk.bf16.mxu0 %vm691_vm3, %v4834_v8 }
 0x133   : > { %v5188_v36 = vadd.f32 %v3770_v6, %v1098_v34  ;;  %v1090_v12 = vadd.f32 %v1089_v20, %v5083_v44  ;;  %v1495_v37 = vpop.f32.mrf.mxu0 }
 0x134   : > { %v3739_v55 = vpop.f32.mrf.mxu1  ;;  %3942 = vmatmul.mubr.msk.bf16.gmra.mxu1 %vm691_vm3, %v4616_v15 }
 0x135   : > { %v5193_v14 = vadd.f32 %v1482_v62, %v1090_v12  ;;  %v1111_v39 = vadd.f32 %v3739_v55, %v5089_v18  ;;  %v3774_v10 = vpop.f32.mrf.mxu0  ;;  %3945 = vmatprep.mubr.msk.bf16.mxu1 %vm691_vm3, %v5948_v26 }
 0x136   : > { %v1102_v23 = vpop.f32.mrf.mxu1 }
 0x137   : > { %v5198_v42 = vadd.f32 %v3773_v19, %v1111_v39  ;;  %v1103_v8 = vadd.f32 %v1102_v23, %v5099_v29  ;;  %v1498_v63 = vpop.f32.mrf.mxu0 }
 0x138   : > { %v3740_v44 = vpop.f32.mrf.mxu1 }
 0x139   : > { %v5201_v24 = vadd.f32 %v1495_v37, %v1103_v8  ;;  %v1114_v53 = vadd.f32 %v3740_v44, %v5105_v43  ;;  %v3777_v15 = vpop.f32.mrf.mxu0  ;;  %3980 = vmatmul.mubr.msk.bf16.gmra.mxu0 %vm691_vm3, %v4867_v13  ;;  %v2478_v37 = vshll.u32 %v5109_v28, 16 }
 0x13a   : > { %v1105_v18 = vpop.f32.mrf.mxu1  ;;  %3983 = vmatprep.mubr.msk.bf16.mxu0 %vm691_vm3, %v4869_v16 }
 0x13b   : > { %v5208_v26 = vadd.f32 %v3774_v10, %v1114_v53  ;;  %v1106_v56 = vadd.f32 %v1105_v18, %v5118_v31  ;;  %v1511_v6 = vpop.f32.mrf.mxu0  ;;  %v2480_v44 = vrot.slane %v2478_v37, 5 }
 0x13c   : > { %v3743_v29 = vpop.f32.mrf.mxu1  ;;  %3946 = vmatmul.mubr.msk.bf16.gmra.mxu1 %vm691_vm3, %v5949_v0 }
 0x13d   : > { %v5213_v30 = vadd.f32 %v1498_v63, %v1106_v56  ;;  %v1127_v43 = vadd.f32 %v3743_v29, %v5126_v25  ;;  %v3778_v1 = vpop.f32.mrf.mxu0  ;;  %3949 = vmatprep.mubr.msk.bf16.mxu1 %vm691_vm3, %v5950_v35 }
 0x13e   : > { %v1118_v13 = vpop.f32.mrf.mxu1 }
 0x13f   : > { %v5218_v62 = vadd.f32 %v3777_v15, %v1127_v43  ;;  %v1119_v16 = vadd.f32 %v1118_v13, %v5131_v41  ;;  %v1514_v59 = vpop.f32.mrf.mxu0  ;;  %v2475_v41 = vshrl.u32 %v5109_v28, 16 }
 0x140   : > { %v3744_v31 = vpop.f32.mrf.mxu1 }
 0x141   : > { %v5221_v34 = vadd.f32 %v1511_v6, %v1119_v16  ;;  %v1130_v19 = vadd.f32 %v3744_v31, %v5137_v51  ;;  %v3781_v0 = vpop.f32.mrf.mxu0  ;;  %3984 = vmatmul.mubr.msk.bf16.gmra.mxu0 %vm691_vm3, %v4784_v21  ;;  %v2484_v51 = vshll.u32 %v5112_v61, 16  ;;  %v2488_v21 = vshrl.u32 %v5112_v61, 16 }
 0x142   : > { %v1121_v25 = vpop.f32.mrf.mxu1  ;;  %3987 = vmatprep.mubr.msk.bf16.mxu0 %vm691_vm3, %v4799_v50 }
 0x143   : > { %v5228_v35 = vadd.f32 %v3778_v1, %v1130_v19  ;;  %v1122_v20 = vadd.f32 %v1121_v25, %v5143_v27  ;;  %v1527_v12 = vpop.f32.mrf.mxu0  ;;  %v2486_v15 = vrot.slane %v2484_v51, 5  ;;  %v2490_v18 = vrot.slane %v2488_v21, 4 }
 0x144   : > { %v3747_v55 = vpop.f32.mrf.mxu1  ;;  %3950 = vmatmul.mubr.msk.bf16.gmra.mxu1 %vm691_vm3, %v5951_v40  ;;  %v2477_v40 = vrot.slane %v2475_v41, 4  ;;  %v3516_v19 = vrot.slane %v5109_v28, 9 }
 0x145   : > { %v5237_v39 = vadd.f32 %v1514_v59, %v1122_v20  ;;  %v1143_v50 = vadd.f32 %v3747_v55, %v5031_v47  ;;  %v3782_v10 = vpop.f32.mrf.mxu0  ;;  %3953 = vmatprep.mubr.msk.bf16.mxu1 %vm691_vm3, %v5952_v57  ;;  %v2705_v57 = vrot.slane %v5112_v61, 5 }
 0x146   : > { %v1134_v27 = vpop.f32.mrf.mxu1 }
 0x147   : > { %v5242_v23 = vadd.f32 %v3781_v0, %v1143_v50  ;;  %v1135_v8 = vadd.f32 %v1134_v27, %v5037_v33  ;;  %v1530_v63 = vpop.f32.mrf.mxu0  ;;  %v252_v33 = vld [vmem:[%s4227_s26 + $0xd4] sm:$0x1] }
 0x148   : > { %v3748_v53 = vpop.f32.mrf.mxu1  ;;  %v2494_v31 = vshll.u32 %v252_v33, 16  ;;  %v2708_v25 = vrot.slane %v252_v33, 5 }
 0x149   : > { %v5245_v56 = vadd.f32 %v1527_v12, %v1135_v8  ;;  %v1146_v47 = vadd.f32 %v3748_v53, %v5047_v17  ;;  %v3785_v6 = vpop.f32.mrf.mxu0  ;;  %3988 = vmatmul.mubr.msk.bf16.gmra.mxu0 %vm691_vm3, %v4821_v52  ;;  %v2481_v17 = vor.u32 %v2480_v44, %v2477_v40 }
 0x14a   : > { %v1137_v29 = vpop.f32.mrf.mxu1  ;;  %3991 = vmatprep.mubr.msk.bf16.mxu0 %vm691_vm3, %v4832_v58  ;;  %v2491_v58 = vor.u32 %v2490_v18, %v2486_v15  ;;  %v2496_v28 = vrot.slane %v2494_v31, 5 }
 0x14b   : > { %v5254_v43 = vadd.f32 %v3782_v10, %v1146_v47  ;;  %v1138_v1 = vadd.f32 %v1137_v29, %v5053_v4  ;;  %v1543_v13 = vpop.f32.mrf.mxu0  ;;  %v2707_v4 = vrot.slane %v2705_v57, 4  ;;  %v2482_v37 = vrot.slane %v2481_v17, 4  ;;  %v5966_v47 = vld [vmem:[#allocation16_spill] sm:$0xff]  ;;  %v5967_v29 = vld [vmem:[#allocation18_spill] sm:$0xff]  ;;  %v5968_v17 = vld [vmem:[#allocation21_spill] sm:$0xff] }
 0x14c   : > { %v3751_v16 = vpop.f32.mrf.mxu1  ;;  %3954 = vmatmul.mubr.msk.bf16.gmra.mxu1 %vm691_vm3, %v5953_v7 }
 0x14d   : > { %v5259_v59 = vadd.f32 %v1530_v63, %v1138_v1  ;;  %v1159_v52 = vadd.f32 %v3751_v16, %v5063_v48  ;;  %v3786_v61 = vpop.f32.mrf.mxu0  ;;  %3957 = vmatprep.mubr.msk.bf16.mxu1 %vm691_vm3, %v4590_v5  ;;  %v2492_v5 = vrot.slane %v2491_v58, 4  ;;  %v2709_v50 = vsel %vm4595_vm7, %v2707_v4, %v2708_v25  ;;  %v5963_v63 = vld [vmem:[#allocation25_spill] sm:$0xff] }
 0x14e   : > { %v1150_v0 = vpop.f32.mrf.mxu1  ;;  %v2487_v40 = vsel %vm4272_vm4, %v2482_v37, %v2486_v15 }
 0x14f   : > { %v5265_v20 = vadd.f32 %v3785_v6, %v1159_v52  ;;  %v1151_v7 = vadd.f32 %v1150_v0, %v5069_v45  ;;  %v1546_v12 = vpop.f32.mrf.mxu0  ;;  %v2706_v45 = vsel %vm4595_vm7, %v3516_v19, %v2705_v57  ;;  %v2497_v60 = vsel %vm4272_vm4, %v2492_v5, %v2496_v28  ;;  %v5969_v19 = vld [vmem:[#allocation23_spill] sm:$0xff] }
 0x150   : > { %v3752_v41 = vpop.f32.mrf.mxu1  ;;  %v3499_v15 = vcombine.low %v2487_v40, %v2497_v60  ;;  %v5971_v5 = vld [vmem:[#allocation3_spill] sm:$0xff]  ;;  %v5973_v40 = vld [vmem:[#allocation6_spill] sm:$0xff] }
 0x151   : > { %v5268_v55 = vadd.f32 %v1543_v13, %v1151_v7  ;;  %v1162_v48 = vadd.f32 %v3752_v41, %v5079_v22  ;;  %v3789_v51 = vpop.f32.mrf.mxu0  ;;  %3992 = vmatmul.mubr.msk.bf16.gmra.mxu0 %vm691_vm3, %v4841_v2 }
 0x152   : > { %v1153_v21 = vpop.f32.mrf.mxu1  ;;  %3995 = vmatprep.mubr.msk.bf16.mxu0 %vm691_vm3, %v4920_v11  ;;  %v5965_v11 = vld [vmem:[#allocation20_spill] sm:$0xff] }
 0x153   : > { %v5279_v10 = vadd.f32 %v3786_v61, %v1162_v48  ;;  %v1154_v22 = vadd.f32 %v1153_v21, %v5085_v49  ;;  %v1559_v27 = vpop.f32.mrf.mxu0  ;;  %v3518_v49 = vcombine.low %v2706_v45, %v2709_v50 }
 0x154   : > { %v3755_v8 = vpop.f32.mrf.mxu1  ;;  %3958 = vmatmul.mubr.msk.bf16.gmra.mxu1 %vm691_vm3, %v5963_v63 }
 0x155   : > { %v5286_v44 = vadd.f32 %v1546_v12, %v1154_v22  ;;  %v1175_v53 = vadd.f32 %v3755_v8, %v5965_v11  ;;  %v3790_v18 = vpop.f32.mrf.mxu0  ;;  %3961 = vmatprep.mubr.msk.bf16.mxu1 %vm691_vm3, %v5966_v47  ;;  %v5970_v12 = vld [vmem:[#allocation8_spill] sm:$0xff] }
 0x156   : > { %v1166_v6 = vpop.f32.mrf.mxu1  ;;  %v5972_v22 = vld [vmem:[#allocation4_spill] sm:$0xff] }
 0x157   : > { %v5293_v57 = vadd.f32 %v3789_v51, %v1175_v53  ;;  %v1167_v33 = vadd.f32 %v1166_v6, %v5967_v29  ;;  %v1562_v1 = vpop.f32.mrf.mxu0 }
 0x158   : > { %v3756_v13 = vpop.f32.mrf.mxu1 }
 0x159   : > { %v5296_v16 = vadd.f32 %v1559_v27, %v1167_v33  ;;  %v1178_v52 = vadd.f32 %v3756_v13, %v5968_v17  ;;  %v3793_v61 = vpop.f32.mrf.mxu0  ;;  %3996 = vmatmul.mubr.msk.bf16.gmra.mxu0 %vm691_vm3, %v3518_v49 }
 0x15a   : > { %v1169_v58 = vpop.f32.mrf.mxu1 }
 0x15b   : > { %v5300_v31 = vadd.f32 %v3790_v18, %v1178_v52  ;;  %v1170_v0 = vadd.f32 %v1169_v58, %v5969_v19  ;;  %v1575_v4 = vpop.f32.mrf.mxu0 }
 0x15c   : > { %v3759_v25 = vpop.f32.mrf.mxu1  ;;  %3962 = vmatmul.mubr.msk.bf16.gmra.mxu1 %vm691_vm3, %v3499_v15 }
 0x15d   : > { %v5304_v7 = vadd.f32 %v1562_v1, %v1170_v0  ;;  %v1191_v41 = vadd.f32 %v3759_v25, %v5970_v12  ;;  %v3794_v37 = vpop.f32.mrf.mxu0 }
 0x15e   : > { %v1182_v48 = vpop.f32.mrf.mxu1 }
 0x15f   : > { %v5307_v51 = vadd.f32 %v3793_v61, %v1191_v41  ;;  %v1183_v28 = vadd.f32 %v1182_v48, %v5971_v5  ;;  %v1578_v21 = vpop.f32.mrf.mxu0 }
 0x160   : > { %v3760_v45 = vpop.f32.mrf.mxu1 }
 0x161   : > { %v5310_v50 = vadd.f32 %v1575_v4, %v1183_v28  ;;  %v1194_v27 = vadd.f32 %v3760_v45, %v5972_v22  ;;  %v3833_v8 = vpop.f32.mrf.mxu0 }
 0x162   : > { %v1185_v63 = vpop.f32.mrf.mxu1 }
 0x163   : > { %v5313_v2 = vadd.f32 %v3794_v37, %v1194_v27  ;;  %v1186_v11 = vadd.f32 %v1185_v63, %v5973_v40  ;;  %v1897_v53 = vpop.f32.mrf.mxu0 }
 0x164   : > { %v3799_v18 = vpop.f32.mrf.mxu1 }
 0x165   : > { %v5316_v47 = vadd.f32 %v1578_v21, %v1186_v11  ;;  %v1798_v60 = vadd.f32 %v3799_v18, %v5158_v54  ;;  %v3834_v49 = vpop.f32.mrf.mxu0 }
 0x166   : > { %v1669_v6 = vpop.f32.mrf.mxu1 }
 0x167   : > { %v5319_v29 = vadd.f32 %v3833_v8, %v1798_v60  ;;  %v1796_v33 = vadd.f32 %v1669_v6, %v5161_v32  ;;  %v1900_v1 = vpop.f32.mrf.mxu0 }
 0x168   : > { %v3800_v13 = vpop.f32.mrf.mxu1 }
 0x169   : > { %v5322_v15 = vadd.f32 %v1897_v53, %v1796_v33  ;;  %v1799_v17 = vadd.f32 %v3800_v13, %v5168_v46  ;;  %v3837_v52 = vpop.f32.mrf.mxu0 }
 0x16a   : > { %v1672_v61 = vpop.f32.mrf.mxu1 }
 0x16b   : > { %v5325_v58 = vadd.f32 %v3834_v49, %v1799_v17  ;;  %v1797_v19 = vadd.f32 %v1672_v61, %v5173_v38  ;;  %v1913_v0 = vpop.f32.mrf.mxu0 }
 0x16c   : > { %v3803_v54 = vpop.f32.mrf.mxu1 }
 0x16d   : > { %v5328_v4 = vadd.f32 %v1900_v1, %v1797_v19  ;;  %v1802_v25 = vadd.f32 %v3803_v54, %v5178_v3  ;;  %v3838_v12 = vpop.f32.mrf.mxu0 }
 0x16e   : > { %v1685_v32 = vpop.f32.mrf.mxu1 }
 0x16f   : > { %v5331_v41 = vadd.f32 %v3837_v52, %v1802_v25  ;;  %v1800_v37 = vadd.f32 %v1685_v32, %v5181_v9  ;;  %v1916_v48 = vpop.f32.mrf.mxu0 }
 0x170   : > { %v3804_v46 = vpop.f32.mrf.mxu1 }
 0x171   : > { %v5334_v5 = vadd.f32 %v1913_v0, %v1800_v37  ;;  %v1803_v28 = vadd.f32 %v3804_v46, %v5188_v36  ;;  %v3841_v21 = vpop.f32.mrf.mxu0 }
 0x172   : > { %v1688_v38 = vpop.f32.mrf.mxu1 }
 0x173   : > { %v5337_v45 = vadd.f32 %v3838_v12, %v1803_v28  ;;  %v1801_v22 = vadd.f32 %v1688_v38, %v5193_v14  ;;  %v1929_v27 = vpop.f32.mrf.mxu0 }
 0x174   : > { %v3807_v3 = vpop.f32.mrf.mxu1 }
 0x175   : > { %v5340_v8 = vadd.f32 %v1916_v48, %v1801_v22  ;;  %v1806_v63 = vadd.f32 %v3807_v3, %v5198_v42  ;;  %v3842_v40 = vpop.f32.mrf.mxu0 }
 0x176   : > { %v1701_v9 = vpop.f32.mrf.mxu1 }
 0x177   : > { %v5343_v11 = vadd.f32 %v3841_v21, %v1806_v63  ;;  %v1804_v53 = vadd.f32 %v1701_v9, %v5201_v24  ;;  %v1932_v18 = vpop.f32.mrf.mxu0 }
 0x178   : > { %v3808_v36 = vpop.f32.mrf.mxu1 }
 0x179   : > { %v5346_v60 = vadd.f32 %v1929_v27, %v1804_v53  ;;  %v1807_v49 = vadd.f32 %v3808_v36, %v5208_v26  ;;  %v3845_v6 = vpop.f32.mrf.mxu0 }
 0x17a   : > { %v1704_v14 = vpop.f32.mrf.mxu1 }
 0x17b   : > { %v5349_v33 = vadd.f32 %v3842_v40, %v1807_v49  ;;  %v1805_v1 = vadd.f32 %v1704_v14, %v5213_v30  ;;  %v1945_v13 = vpop.f32.mrf.mxu0 }
 0x17c   : > { %v3811_v42 = vpop.f32.mrf.mxu1 }
 0x17d   : > { %v5352_v17 = vadd.f32 %v1932_v18, %v1805_v1  ;;  %v1810_v52 = vadd.f32 %v3811_v42, %v5218_v62  ;;  %v3846_v61 = vpop.f32.mrf.mxu0 }
 0x17e   : > { %v1717_v24 = vpop.f32.mrf.mxu1 }
 0x17f   : > { %5974 = vst [vmem:[#allocation9_spill] sm:$0xff] %v5352_v17  ;;  %v5355_v19 = vadd.f32 %v3845_v6, %v1810_v52  ;;  %v1808_v0 = vadd.f32 %v1717_v24, %v5221_v34  ;;  %v1948_v54 = vpop.f32.mrf.mxu0 }
 0x180   : > { %v3812_v26 = vpop.f32.mrf.mxu1 }
 0x181   : > { %5975 = vst [vmem:[#allocation7_spill] sm:$0xff] %v5355_v19  ;;  %v5358_v25 = vadd.f32 %v1945_v13, %v1808_v0  ;;  %v1811_v12 = vadd.f32 %v3812_v26, %v5228_v35  ;;  %v3849_v32 = vpop.f32.mrf.mxu0 }
 0x182   : > { %v1720_v30 = vpop.f32.mrf.mxu1 }
 0x183   : > { %5976 = vst [vmem:[#allocation11_spill] sm:$0xff] %v5358_v25  ;;  %v5361_v37 = vadd.f32 %v3846_v61, %v1811_v12  ;;  %v1809_v48 = vadd.f32 %v1720_v30, %v5237_v39  ;;  %v1961_v46 = vpop.f32.mrf.mxu0 }
 0x184   : > { %v3815_v62 = vpop.f32.mrf.mxu1 }
 0x185   : > { %5977 = vst [vmem:[#allocation13_spill] sm:$0xff] %v5361_v37  ;;  %v5364_v28 = vadd.f32 %v1948_v54, %v1809_v48  ;;  %v1814_v21 = vadd.f32 %v3815_v62, %v5242_v23  ;;  %v3850_v38 = vpop.f32.mrf.mxu0 }
 0x186   : > { %v1733_v34 = vpop.f32.mrf.mxu1 }
 0x187   : > { %v5367_v22 = vadd.f32 %v3849_v32, %v1814_v21  ;;  %v1812_v27 = vadd.f32 %v1733_v34, %v5245_v56  ;;  %v1964_v3 = vpop.f32.mrf.mxu0 }
 0x188   : > { %v3816_v35 = vpop.f32.mrf.mxu1 }
 0x189   : > { %v5370_v63 = vadd.f32 %v1961_v46, %v1812_v27  ;;  %v1815_v40 = vadd.f32 %v3816_v35, %v5254_v43  ;;  %v3853_v9 = vpop.f32.mrf.mxu0 }
 0x18a   : > { %v1736_v39 = vpop.f32.mrf.mxu1 }
 0x18b   : > { %v5373_v53 = vadd.f32 %v3850_v38, %v1815_v40  ;;  %v1813_v18 = vadd.f32 %v1736_v39, %v5259_v59  ;;  %v1977_v36 = vpop.f32.mrf.mxu0 }
 0x18c   : > { %v3819_v23 = vpop.f32.mrf.mxu1 }
 0x18d   : > { %v5376_v49 = vadd.f32 %v1964_v3, %v1813_v18  ;;  %v1818_v6 = vadd.f32 %v3819_v23, %v5265_v20  ;;  %v3854_v14 = vpop.f32.mrf.mxu0 }
 0x18e   : > { %v1749_v56 = vpop.f32.mrf.mxu1 }
 0x18f   : > { %v5379_v1 = vadd.f32 %v3853_v9, %v1818_v6  ;;  %v1816_v13 = vadd.f32 %v1749_v56, %v5268_v55  ;;  %v1980_v42 = vpop.f32.mrf.mxu0 }
 0x190   : > { %v3820_v43 = vpop.f32.mrf.mxu1 }
 0x191   : > { %v5382_v52 = vadd.f32 %v1977_v36, %v1816_v13  ;;  %v1819_v61 = vadd.f32 %v3820_v43, %v5279_v10  ;;  %v3857_v24 = vpop.f32.mrf.mxu0 }
 0x192   : > { %v1752_v59 = vpop.f32.mrf.mxu1 }
 0x193   : > { %v5385_v0 = vadd.f32 %v3854_v14, %v1819_v61  ;;  %v1817_v54 = vadd.f32 %v1752_v59, %v5286_v44  ;;  %v1993_v26 = vpop.f32.mrf.mxu0 }
 0x194   : > { %v3823_v20 = vpop.f32.mrf.mxu1 }
 0x195   : > { %v5388_v12 = vadd.f32 %v1980_v42, %v1817_v54  ;;  %v1822_v32 = vadd.f32 %v3823_v20, %v5293_v57  ;;  %v3858_v30 = vpop.f32.mrf.mxu0 }
 0x196   : > { %v1765_v55 = vpop.f32.mrf.mxu1 }
 0x197   : > { %v5391_v48 = vadd.f32 %v3857_v24, %v1822_v32  ;;  %v1820_v46 = vadd.f32 %v1765_v55, %v5296_v16  ;;  %v1996_v62 = vpop.f32.mrf.mxu0 }
 0x198   : > { %v3824_v10 = vpop.f32.mrf.mxu1 }
 0x199   : > { %v5394_v21 = vadd.f32 %v1993_v26, %v1820_v46  ;;  %v1823_v38 = vadd.f32 %v3824_v10, %v5300_v31  ;;  %v3861_v34 = vpop.f32.mrf.mxu0 }
 0x19a   : > { %v1768_v44 = vpop.f32.mrf.mxu1 }
 0x19b   : > { %v5397_v27 = vadd.f32 %v3858_v30, %v1823_v38  ;;  %v1821_v3 = vadd.f32 %v1768_v44, %v5304_v7  ;;  %v2009_v35 = vpop.f32.mrf.mxu0 }
 0x19c   : > { %v3827_v57 = vpop.f32.mrf.mxu1 }
 0x19d   : > { %v5400_v40 = vadd.f32 %v1996_v62, %v1821_v3  ;;  %v1826_v9 = vadd.f32 %v3827_v57, %v5307_v51  ;;  %v3862_v39 = vpop.f32.mrf.mxu0 }
 0x19e   : > { %v1781_v16 = vpop.f32.mrf.mxu1 }
 0x19f   : > { %v5403_v18 = vadd.f32 %v3861_v34, %v1826_v9  ;;  %v1824_v36 = vadd.f32 %v1781_v16, %v5310_v50  ;;  %v2012_v23 = vpop.f32.mrf.mxu0 }
 0x1a0   : > { %v3828_v31 = vpop.f32.mrf.mxu1 }
 0x1a1   : > { %v5406_v6 = vadd.f32 %v2009_v35, %v1824_v36  ;;  %v1827_v14 = vadd.f32 %v3828_v31, %v5313_v2  ;;  %v5409_v56 = vpop.f32.mrf.mxu0 }
 0x1a2   : > { %v1784_v7 = vpop.f32.mrf.mxu1 }
 0x1a3   : > { %v5411_v13 = vadd.f32 %v3862_v39, %v1827_v14  ;;  %v1825_v42 = vadd.f32 %v1784_v7, %v5316_v47  ;;  %v5414_v51 = vpop.f32.mrf.mxu0 }
 0x1a4   : > { %v5416_v43 = vpop.f32.mrf.mxu1 }
 0x1a5   : > { %v5418_v61 = vadd.f32 %v2012_v23, %v1825_v42  ;;  %v5420_v50 = vpop.f32.mrf.mxu0 }
 0x1a6   : > { %v5422_v24 = vpop.f32.mrf.mxu1 }
 0x1a7   : > { %v5424_v59 = vpop.f32.mrf.mxu0 }
 0x1a8   : > { %v5426_v2 = vpop.f32.mrf.mxu1 }
 0x1a9   : > { %v5428_v54 = vpop.f32.mrf.mxu0 }
 0x1aa   : > { %v5430_v26 = vpop.f32.mrf.mxu1 }
 0x1ab   : > { %v5432_v20 = vpop.f32.mrf.mxu0 }
 0x1ac   : > { %v5434_v47 = vpop.f32.mrf.mxu1 }
 0x1ad   : > { %v5436_v32 = vpop.f32.mrf.mxu0 }
 0x1ae   : > { %v5438_v30 = vpop.f32.mrf.mxu1 }
 0x1af   : > { %v5440_v55 = vpop.f32.mrf.mxu0 }
 0x1b0   : > { %v5442_v46 = vpop.f32.mrf.mxu1 }
 0x1b1   : > { %v5444_v62 = vpop.f32.mrf.mxu0 }
 0x1b2   : > { %5978 = vst [vmem:[#allocation15_spill] sm:$0xff] %v5444_v62  ;;  %v5446_v10 = vpop.f32.mrf.mxu1 }
 0x1b3   : > { %v5448_v38 = vpop.f32.mrf.mxu0 }
 0x1b4   : > { %5979 = vst [vmem:[#allocation19_spill] sm:$0xff] %v5448_v38  ;;  %v5450_v34 = vpop.f32.mrf.mxu1 }
 0x1b5   : > { %v5452_v44 = vpop.f32.mrf.mxu0 }
 0x1b6   : > { %5980 = vst [vmem:[#allocation24_spill] sm:$0xff] %v5452_v44  ;;  %v5454_v3 = vpop.f32.mrf.mxu1 }
 0x1b7   : > { %v5456_v35 = vpop.f32.mrf.mxu0 }
 0x1b8   : > { %5981 = vst [vmem:[#allocation5_spill] sm:$0xff] %v5456_v35  ;;  %v5458_v57 = vpop.f32.mrf.mxu1 }
 0x1b9   : > { %v5460_v9 = vpop.f32.mrf.mxu0 }
 0x1ba   : > { %5982 = vst [vmem:[#allocation10_spill] sm:$0xff] %v5460_v9  ;;  %v5462_v39 = vpop.f32.mrf.mxu1 }
 0x1bb   : > { %5983 = vst [vmem:[#allocation12_spill] sm:$0xff] %v5462_v39  ;;  %v5464_v16 = vpop.f32.mrf.mxu0 }
 0x1bc   : > { %5984 = vst [vmem:[#allocation14_spill] sm:$0xff] %v5464_v16  ;;  %v5466_v36 = vpop.f32.mrf.mxu1 }
 0x1bd   : > { %5985 = vst [vmem:[#allocation17_spill] sm:$0xff] %v5466_v36  ;;  %v5468_v23 = vpop.f32.mrf.mxu0 }
 0x1be   : > { %5986 = vst [vmem:[#allocation22_spill] sm:$0xff] %v5468_v23  ;;  %v5470_v31 = vpop.f32.mrf.mxu1 }
 0x1bf   : > { %5987 = vst [vmem:[#allocation25_spill] sm:$0xff] %v5470_v31  ;;  %v2366_v14 = vpop.f32.mrf.mxu0 }
 0x1c0   : > { %v5472_v7 = vpop.f32.mrf.mxu1 }
 0x1c1   : > { %5988 = vst [vmem:[#allocation2_spill] sm:$0xff] %v5472_v7  ;;  %v3917_v42 = vpop.f32.mrf.mxu0 }
 0x1c2   : > { %v2160_v37 = vpop.f32.mrf.mxu1 }
 0x1c3   : > { %v2249_v25 = vadd.f32 %v2160_v37, %v5364_v28  ;;  %v2379_v35 = vpop.f32.mrf.mxu0 }
 0x1c4   : > { %v3883_v19 = vpop.f32.mrf.mxu1 }
 0x1c5   : > { %v5475_v9 = vadd.f32 %v2366_v14, %v2249_v25  ;;  %v2254_v39 = vadd.f32 %v3883_v19, %v5367_v22  ;;  %v3918_v16 = vpop.f32.mrf.mxu0 }
 0x1c6   : > { %v2173_v17 = vpop.f32.mrf.mxu1 }
 0x1c7   : > { %v5478_v36 = vadd.f32 %v3917_v42, %v2254_v39  ;;  %v2252_v23 = vadd.f32 %v2173_v17, %v5370_v63  ;;  %v2382_v31 = vpop.f32.mrf.mxu0 }
 0x1c8   : > { %v3884_v44 = vpop.f32.mrf.mxu1 }
 0x1c9   : > { %v5481_v38 = vadd.f32 %v2379_v35, %v2252_v23  ;;  %v2255_v7 = vadd.f32 %v3884_v44, %v5373_v53  ;;  %v3921_v62 = vpop.f32.mrf.mxu0 }
 0x1ca   : > { %v2176_v37 = vpop.f32.mrf.mxu1 }
 0x1cb   : > { %v5484_v28 = vadd.f32 %v3918_v16, %v2255_v7  ;;  %v2253_v25 = vadd.f32 %v2176_v37, %v5376_v49  ;;  %v2395_v14 = vpop.f32.mrf.mxu0 }
 0x1cc   : > { %v3887_v19 = vpop.f32.mrf.mxu1 }
 0x1cd   : > { %v5487_v22 = vadd.f32 %v2382_v31, %v2253_v25  ;;  %v2258_v39 = vadd.f32 %v3887_v19, %v5379_v1  ;;  %v3922_v42 = vpop.f32.mrf.mxu0 }
 0x1ce   : > { %v2189_v17 = vpop.f32.mrf.mxu1 }
 0x1cf   : > { %v5490_v63 = vadd.f32 %v3921_v62, %v2258_v39  ;;  %v2256_v35 = vadd.f32 %v2189_v17, %v5382_v52  ;;  %v2398_v23 = vpop.f32.mrf.mxu0 }
 0x1d0   : > { %v3888_v53 = vpop.f32.mrf.mxu1 }
 0x1d1   : > { %v5493_v44 = vadd.f32 %v2395_v14, %v2256_v35  ;;  %v2259_v16 = vadd.f32 %v3888_v53, %v5385_v0  ;;  %v3925_v7 = vpop.f32.mrf.mxu0 }
 0x1d2   : > { %v2192_v49 = vpop.f32.mrf.mxu1 }
 0x1d3   : > { %v5496_v37 = vadd.f32 %v3922_v42, %v2259_v16  ;;  %v2257_v31 = vadd.f32 %v2192_v49, %v5388_v12  ;;  %v2411_v25 = vpop.f32.mrf.mxu0 }
 0x1d4   : > { %v3891_v1 = vpop.f32.mrf.mxu1 }
 0x1d5   : > { %v5499_v19 = vadd.f32 %v2398_v23, %v2257_v31  ;;  %v2262_v62 = vadd.f32 %v3891_v1, %v5391_v48  ;;  %v3926_v39 = vpop.f32.mrf.mxu0 }
 0x1d6   : > { %v2205_v52 = vpop.f32.mrf.mxu1 }
 0x1d7   : > { %v5502_v17 = vadd.f32 %v3925_v7, %v2262_v62  ;;  %v2260_v14 = vadd.f32 %v2205_v52, %v5394_v21  ;;  %v2414_v35 = vpop.f32.mrf.mxu0 }
 0x1d8   : > { %v3892_v0 = vpop.f32.mrf.mxu1 }
 0x1d9   : > { %v5505_v53 = vadd.f32 %v2411_v25, %v2260_v14  ;;  %v2263_v42 = vadd.f32 %v3892_v0, %v5397_v27  ;;  %v3929_v16 = vpop.f32.mrf.mxu0  ;;  %v2238_v25 = vadd.f32 %v5416_v43, %v5319_v29  ;;  %v2239_v29 = vadd.f32 %v5426_v2, %v5325_v58 }
 0x1da   : > { %v2208_v12 = vpop.f32.mrf.mxu1 }
 0x1db   : > { %v5508_v49 = vadd.f32 %v3926_v39, %v2263_v42  ;;  %v2261_v23 = vadd.f32 %v2208_v12, %v5400_v40  ;;  %v2427_v31 = vpop.f32.mrf.mxu0  ;;  %v2236_v40 = vadd.f32 %v5422_v24, %v5322_v15  ;;  %v2444_v12 = vadd.f32 %v5409_v56, %v2238_v25  ;;  %v5538_v56 = vld [vmem:[%s5853_s2] ss:$0 sm:$0xff] }
 0x1dc   : > { %v3895_v48 = vpop.f32.mrf.mxu1  ;;  %v2237_v15 = vadd.f32 %v5430_v26, %v5328_v4  ;;  %v2445_v2 = vadd.f32 %v5420_v50, %v2239_v29  ;;  %v2240_v4 = vadd.f32 %v5438_v30, %v5334_v5  ;;  %v2243_v26 = vadd.f32 %v5442_v46, %v5337_v45 }
 0x1dd   : > { %v5511_v1 = vadd.f32 %v2414_v35, %v2261_v23  ;;  %v2266_v7 = vadd.f32 %v3895_v48, %v5403_v18  ;;  %v3930_v62 = vpop.f32.mrf.mxu0  ;;  %v2442_v48 = vadd.f32 %v5414_v51, %v2236_v40  ;;  %v2242_v51 = vadd.f32 %v5434_v47, %v5331_v41 }
 0x1de   : > { %v2221_v21 = vpop.f32.mrf.mxu1  ;;  %v2443_v50 = vadd.f32 %v5424_v59, %v2237_v15  ;;  %v2241_v41 = vadd.f32 %v5446_v10, %v5340_v8  ;;  %v2246_v5 = vadd.f32 %v5450_v34, %v5343_v11  ;;  %v2244_v45 = vadd.f32 %v5454_v3, %v5346_v60 }
 0x1df   : > { %v5516_v52 = vadd.f32 %v3929_v16, %v2266_v7  ;;  %v2264_v27 = vadd.f32 %v2221_v21, %v5406_v6  ;;  %v2430_v14 = vpop.f32.mrf.mxu0  ;;  %v5550_v21 = vld [vmem:[%s5854_s3] ss:$0 sm:$0xff]  ;;  %v2449_v8 = vadd.f32 %v5436_v32, %v2243_v26  ;;  %v2247_v11 = vadd.f32 %v5458_v57, %v5349_v33 }
 0x1e0   : > { %v3896_v39 = vpop.f32.mrf.mxu1 }
 0x1e1   : > { %v5521_v0 = vadd.f32 %v2427_v31, %v2264_v27  ;;  %v2267_v35 = vadd.f32 %v3896_v39, %v5411_v13  ;;  %v3969_v42 = vpop.f32.mrf.mxu0 }
 0x1e2   : > { %v2224_v18 = vpop.f32.mrf.mxu1 }
 0x1e3   : > { %v5527_v43 = vadd.f32 %v3930_v62, %v2267_v35  ;;  %v2265_v6 = vadd.f32 %v2224_v18, %v5418_v61  ;;  %v2755_v16 = vpop.f32.mrf.mxu0  ;;  %v2448_v18 = vadd.f32 %v5428_v54, %v2242_v51  ;;  %v5989_v54 = vld [vmem:[#allocation15_spill] sm:$0xff] }
 0x1e4   : > { %v3935_v23 = vpop.f32.mrf.mxu1 }
 0x1e5   : > { %v5533_v24 = vadd.f32 %v2430_v14, %v2265_v6  ;;  %v2672_v13 = vadd.f32 %v3935_v23, %v2444_v12  ;;  %v3970_v31 = vpop.f32.mrf.mxu0  ;;  %v2446_v12 = vadd.f32 %v5432_v20, %v2240_v4  ;;  %v2452_v23 = vadd.f32 %v5989_v54, %v2246_v5  ;;  %v5990_v20 = vld [vmem:[#allocation19_spill] sm:$0xff] }
 0x1e6   : > { %v2543_v58 = vpop.f32.mrf.mxu1 }
 0x1e7   : > { %v2884_v61 = vadd.f32 %v3969_v42, %v2672_v13  ;;  %v2670_v7 = vadd.f32 %v2543_v58, %v2442_v48  ;;  %v2758_v62 = vpop.f32.mrf.mxu0  ;;  %v2450_v48 = vadd.f32 %v5990_v20, %v2244_v45 }
 0x1e8   : > { %v3936_v25 = vpop.f32.mrf.mxu1 }
 0x1e9   : > { %v2923_v27 = vmul.f32 %v5538_v56, %v2884_v61  ;;  %v2882_v14 = vadd.f32 %v2755_v16, %v2670_v7  ;;  %v2673_v39 = vadd.f32 %v3936_v25, %v2445_v2  ;;  %v3973_v40 = vpop.f32.mrf.mxu0  ;;  %v2447_v16 = vadd.f32 %v5440_v55, %v2241_v41  ;;  %v5991_v2 = vld [vmem:[#allocation24_spill] sm:$0xff]  ;;  %v5992_v7 = vld [vmem:[#allocation9_spill] sm:$0xff] }
 0x1ea   : > { %v2546_v47 = vpop.f32.mrf.mxu1  ;;  %v2453_v61 = vadd.f32 %v5991_v2, %v2247_v11  ;;  %v5995_v41 = vld [vmem:[#allocation17_spill] sm:$0xff] }
 0x1eb   : > { %v5561_v30 = vadd.f32 %v5550_v21, %v2923_v27  ;;  %v2921_v59 = vmul.f32 %v5538_v56, %v2882_v14  ;;  %v2885_v46 = vadd.f32 %v3970_v31, %v2673_v39  ;;  %v2671_v35 = vadd.f32 %v2546_v47, %v2443_v50  ;;  %v2771_v42 = vpop.f32.mrf.mxu0  ;;  %v5994_v39 = vld [vmem:[#allocation7_spill] sm:$0xff]  ;;  %v5996_v11 = vld [vmem:[#allocation5_spill] sm:$0xff] }
 0x1ec   : > { %v3939_v10 = vpop.f32.mrf.mxu1  ;;  %v2250_v5 = vadd.f32 %v5995_v41, %v5994_v39 }
 0x1ed   : > { %v2994_v60 = vsub.f32 0.0, %v5561_v30  ;;  %v5571_v34 = vadd.f32 %v5550_v21, %v2921_v59  ;;  %v2924_v3 = vmul.f32 %v5538_v56, %v2885_v46  ;;  %v2883_v29 = vadd.f32 %v2758_v62, %v2671_v35  ;;  %v3974_v6 = vpop.f32.mrf.mxu0  ;;  %v5993_v62 = vld [vmem:[#allocation12_spill] sm:$0xff] }
 0x1ee   : > { %v2676_v32 = vadd.f32 %v3939_v10, %v2448_v18  ;;  %v2559_v15 = vpop.f32.mrf.mxu1  ;;  %v2245_v55 = vadd.f32 %v5993_v62, %v5992_v7 }
 0x1ef   : > { %v3028_v13 = vmul.f32 1.442695, %v2994_v60  ;;  %v2992_v33 = vsub.f32 0.0, %v5571_v34  ;;  %v5579_v57 = vadd.f32 %v5550_v21, %v2924_v3  ;;  %v2922_v31 = vmul.f32 %v5538_v56, %v2883_v29  ;;  %v2774_v58 = vpop.f32.mrf.mxu0 }
 0x1f0   : > { %v2888_v51 = vadd.f32 %v3973_v40, %v2676_v32  ;;  %v2674_v4 = vadd.f32 %v2559_v15, %v2446_v12  ;;  %v3940_v26 = vpop.f32.mrf.mxu1  ;;  %v2451_v10 = vadd.f32 %v5996_v11, %v2245_v55  ;;  %v5997_v15 = vld [vmem:[#allocation10_spill] sm:$0xff] }
 0x1f1   : > { %4038 = vpow2.f32 %v3028_v13  ;;  %v3024_v25 = vmul.f32 1.442695, %v2992_v33  ;;  %v2995_v50 = vsub.f32 0.0, %v5579_v57  ;;  %v5587_v27 = vadd.f32 %v5550_v21, %v2922_v31  ;;  %v3977_v14 = vpop.f32.mrf.mxu0 }
 0x1f2   : > { %v2927_v45 = vmul.f32 %v5538_v56, %v2888_v51  ;;  %v2886_v47 = vadd.f32 %v2771_v42, %v2674_v4  ;;  %v2677_v59 = vadd.f32 %v3940_v26, %v2449_v8  ;;  %v2562_v46 = vpop.f32.mrf.mxu1  ;;  %v2456_v13 = vadd.f32 %v5997_v15, %v2250_v5  ;;  %v5998_v51 = vld [vmem:[#allocation11_spill] sm:$0xff] }
 0x1f3   : > { %4040 = vpow2.f32 %v3024_v25  ;;  %v3030_v40 = vmul.f32 1.442695, %v2995_v50  ;;  %v2993_v35 = vsub.f32 0.0, %v5587_v27  ;;  %v2675_v18 = vadd.f32 %v2562_v46, %v2447_v16  ;;  %v2787_v12 = vpop.f32.mrf.mxu0 }
 0x1f4   : > { %v5595_v60 = vadd.f32 %v5550_v21, %v2927_v45  ;;  %v2925_v3 = vmul.f32 %v5538_v56, %v2886_v47  ;;  %v2889_v29 = vadd.f32 %v3974_v6, %v2677_v59  ;;  %v3943_v54 = vpop.f32.mrf.mxu1  ;;  %v6001_v47 = vld [vmem:[#allocation2_spill] sm:$0xff] }
 0x1f5   : > { %4042 = vpow2.f32 %v3030_v40  ;;  %v3026_v20 = vmul.f32 1.442695, %v2993_v35  ;;  %v2887_v42 = vadd.f32 %v2774_v58, %v2675_v18  ;;  %v2680_v8 = vadd.f32 %v3943_v54, %v2452_v23  ;;  %v3978_v32 = vpop.f32.mrf.mxu0  ;;  %v5999_v58 = vld [vmem:[#allocation25_spill] sm:$0xff] }
 0x1f6   : > { %v2998_v33 = vsub.f32 0.0, %v5595_v60  ;;  %v5601_v16 = vadd.f32 %v5550_v21, %v2925_v3  ;;  %v2928_v31 = vmul.f32 %v5538_v56, %v2889_v29  ;;  %v2575_v2 = vpop.f32.mrf.mxu1  ;;  %v2248_v23 = vadd.f32 %v5999_v58, %v5998_v51 }
 0x1f7   : > { %4044 = vpow2.f32 %v3026_v20  ;;  %v2926_v7 = vmul.f32 %v5538_v56, %v2887_v42  ;;  %v2892_v6 = vadd.f32 %v3977_v14, %v2680_v8  ;;  %v2678_v62 = vadd.f32 %v2575_v2, %v2450_v48  ;;  %v2790_v55 = vpop.f32.mrf.mxu0  ;;  %v6000_v48 = vld [vmem:[#allocation13_spill] sm:$0xff] }
 0x1f8   : > { %v3036_v4 = vmul.f32 1.442695, %v2998_v33  ;;  %v2996_v26 = vsub.f32 0.0, %v5601_v16  ;;  %v5609_v25 = vadd.f32 %v5550_v21, %v2928_v31  ;;  %v3944_v50 = vpop.f32.mrf.mxu1  ;;  %v2251_v59 = vadd.f32 %v6001_v47, %v6000_v48 }
 0x1f9   : > { %v5612_v39 = vadd.f32 %v5550_v21, %v2926_v7  ;;  %v2931_v41 = vmul.f32 %v5538_v56, %v2892_v6  ;;  %v2890_v5 = vadd.f32 %v2787_v12, %v2678_v62  ;;  %v2681_v45 = vadd.f32 %v3944_v50, %v2453_v61  ;;  %v3981_v14 = vpop.f32.mrf.mxu0  ;;  %v6002_v12 = vld [vmem:[#allocation14_spill] sm:$0xff] }
 0x1fa   : > { %4046 = vpow2.f32 %v3036_v4  ;;  %v3032_v46 = vmul.f32 1.442695, %v2996_v26  ;;  %v2999_v40 = vsub.f32 0.0, %v5609_v25  ;;  %v2578_v35 = vpop.f32.mrf.mxu1  ;;  %v2454_v61 = vadd.f32 %v6002_v12, %v2248_v23  ;;  %v6003_v62 = vld [vmem:[#allocation22_spill] sm:$0xff] }
 0x1fb   : > { %v2997_v18 = vsub.f32 0.0, %v5612_v39  ;;  %v5620_v11 = vadd.f32 %v5550_v21, %v2931_v41  ;;  %v2929_v3 = vmul.f32 %v5538_v56, %v2890_v5  ;;  %v2893_v29 = vadd.f32 %v3978_v32, %v2681_v45  ;;  %v2803_v54 = vpop.f32.mrf.mxu0 }
 0x1fc   : > { %4048 = vpow2.f32 %v3032_v46  ;;  %v3038_v20 = vmul.f32 1.442695, %v2999_v40  ;;  %v2679_v42 = vadd.f32 %v2578_v35, %v2451_v10  ;;  %v3947_v8 = vpop.f32.mrf.mxu1  ;;  %v2457_v51 = vadd.f32 %v6003_v62, %v2251_v59 }
 0x1fd   : > { %v3034_v15 = vmul.f32 1.442695, %v2997_v18  ;;  %v3002_v33 = vsub.f32 0.0, %v5620_v11  ;;  %v5626_v31 = vadd.f32 %v5550_v21, %v2929_v3  ;;  %v2932_v2 = vmul.f32 %v5538_v56, %v2893_v29  ;;  %v3982_v7 = vpop.f32.mrf.mxu0 }
 0x1fe   : > { %v4039_v6 = vpop.eup %4038  ;;  %4050 = vpow2.f32 %v3038_v20  ;;  %v2891_v32 = vadd.f32 %v2790_v55, %v2679_v42  ;;  %v2684_v58 = vadd.f32 %v3947_v8, %v2456_v13  ;;  %v2591_v23 = vpop.f32.mrf.mxu1 }
 0x1ff   : > { %v3090_v4 = vadd.f32 1.0, %v4039_v6  ;;  %4052 = vpow2.f32 %v3034_v15  ;;  %v3044_v10 = vmul.f32 1.442695, %v3002_v33  ;;  %v3000_v26 = vsub.f32 0.0, %v5626_v31  ;;  %v2806_v50 = vpop.f32.mrf.mxu0 }
 0x200   : > { %v4041_v41 = vpop.eup %4040  ;;  %v5632_v5 = vadd.f32 %v5550_v21, %v2932_v2  ;;  %v2930_v45 = vmul.f32 %v5538_v56, %v2891_v32  ;;  %v2896_v48 = vadd.f32 %v3981_v14, %v2684_v58  ;;  %v2682_v47 = vadd.f32 %v2591_v23, %v2454_v61  ;;  %v3948_v46 = vpop.f32.mrf.mxu1 }
 0x201   : > { %4054 = vrcp.f32 %v3090_v4  ;;  %v3088_v59 = vadd.f32 1.0, %v4041_v41  ;;  %v3040_v55 = vmul.f32 1.442695, %v3000_v26  ;;  %v2685_v13 = vadd.f32 %v3948_v46, %v2457_v51  ;;  %v3985_v40 = vpop.f32.mrf.mxu0 }
 0x202   : > { %v4043_v35 = vpop.eup %4042  ;;  %4056 = vpow2.f32 %v3044_v10  ;;  %v3003_v18 = vsub.f32 0.0, %v5632_v5  ;;  %v5637_v3 = vadd.f32 %v5550_v21, %v2930_v45  ;;  %v2935_v29 = vmul.f32 %v5538_v56, %v2896_v48  ;;  %v2594_v12 = vpop.f32.mrf.mxu1 }
 0x203   : > { %4058 = vrcp.f32 %v3088_v59  ;;  %v3091_v20 = vadd.f32 1.0, %v4043_v35  ;;  %v2894_v14 = vadd.f32 %v2803_v54, %v2682_v47  ;;  %v2897_v61 = vadd.f32 %v3982_v7, %v2685_v13  ;;  %v2819_v42 = vpop.f32.mrf.mxu0 }
 0x204   : > { %v4045_v8 = vpop.eup %4044  ;;  %4060 = vpow2.f32 %v3040_v55  ;;  %v3046_v15 = vmul.f32 1.442695, %v3003_v18  ;;  %v3001_v33 = vsub.f32 0.0, %v5637_v3  ;;  %v5642_v2 = vadd.f32 %v5550_v21, %v2935_v29  ;;  %v3951_v6 = vpop.f32.mrf.mxu1 }
 0x205   : > { %4062 = vrcp.f32 %v3091_v20  ;;  %v3089_v62 = vadd.f32 1.0, %v4045_v8  ;;  %v2933_v51 = vmul.f32 %v5538_v56, %v2894_v14  ;;  %v2936_v32 = vmul.f32 %v5538_v56, %v2897_v61  ;;  %v3986_v58 = vpop.f32.mrf.mxu0 }
 0x206   : > { %4064 = vpow2.f32 %v3046_v15  ;;  %v3042_v54 = vmul.f32 1.442695, %v3001_v33  ;;  %v3006_v7 = vsub.f32 0.0, %v5642_v2  ;;  %v2683_v23 = vadd.f32 %v2594_v12, %v5475_v9  ;;  %v2607_v4 = vpop.f32.mrf.mxu1 }
 0x207   : > { %v4047_v10 = vpop.eup %4046  ;;  %4066 = vrcp.f32 %v3089_v62  ;;  %v5649_v26 = vadd.f32 %v5550_v21, %v2933_v51  ;;  %v5652_v41 = vadd.f32 %v5550_v21, %v2936_v32  ;;  %v2688_v45 = vadd.f32 %v3951_v6, %v5478_v36  ;;  %v2822_v48 = vpop.f32.mrf.mxu0 }
 0x208   : > { %v3094_v47 = vadd.f32 1.0, %v4047_v10  ;;  %4068 = vpow2.f32 %v3042_v54  ;;  %v3052_v46 = vmul.f32 1.442695, %v3006_v7  ;;  %v2895_v59 = vadd.f32 %v2806_v50, %v2683_v23  ;;  %v3952_v55 = vpop.f32.mrf.mxu1 }
 0x209   : > { %v4049_v13 = vpop.eup %4048  ;;  %v3004_v9 = vsub.f32 0.0, %v5649_v26  ;;  %v3007_v35 = vsub.f32 0.0, %v5652_v41  ;;  %v2900_v18 = vadd.f32 %v3985_v40, %v2688_v45  ;;  %v2686_v29 = vadd.f32 %v2607_v4, %v5481_v38  ;;  %v5658_v12 = vpop.f32.mrf.mxu0 }
 0x20a   : > { %4070 = vrcp.f32 %v3094_v47  ;;  %v3092_v20 = vadd.f32 1.0, %v4049_v13  ;;  %v2934_v36 = vmul.f32 %v5538_v56, %v2895_v59  ;;  %v2689_v14 = vadd.f32 %v3952_v55, %v5484_v28  ;;  %v2610_v61 = vpop.f32.mrf.mxu1 }
 0x20b   : > { %v4051_v8 = vpop.eup %4050  ;;  %4072 = vpow2.f32 %v3052_v46  ;;  %v3048_v50 = vmul.f32 1.442695, %v3004_v9  ;;  %v3054_v15 = vmul.f32 1.442695, %v3007_v35  ;;  %v2939_v33 = vmul.f32 %v5538_v56, %v2900_v18  ;;  %v5664_v6 = vpop.f32.mrf.mxu0 }
 0x20c   : > { %v4053_v40 = vpop.eup %4052  ;;  %4074 = vrcp.f32 %v3092_v20  ;;  %v3095_v38 = vadd.f32 1.0, %v4051_v8  ;;  %v5667_v62 = vadd.f32 %v5550_v21, %v2934_v36  ;;  %v2898_v51 = vadd.f32 %v2819_v42, %v2686_v29  ;;  %v3955_v32 = vpop.f32.mrf.mxu1 }
 0x20d   : > { %v3093_v54 = vadd.f32 1.0, %v4053_v40  ;;  %4076 = vpow2.f32 %v3048_v50  ;;  %v5670_v28 = vadd.f32 %v5550_v21, %v2939_v33  ;;  %v2901_v7 = vadd.f32 %v3986_v58, %v2689_v14  ;;  %v5672_v23 = vpop.f32.mrf.mxu0 }
 0x20e   : > { %v4055_v4 = vpop.eup %4054  ;;  %4078 = vrcp.f32 %v3095_v38  ;;  %v3005_v10 = vsub.f32 0.0, %v5667_v62  ;;  %v2937_v42 = vmul.f32 %v5538_v56, %v2898_v51  ;;  %v2687_v45 = vadd.f32 %v2610_v61, %v5487_v22  ;;  %v2623_v47 = vpop.f32.mrf.mxu1 }
 0x20f   : > { %v4057_v46 = vpop.eup %4056  ;;  %v3186_v58 = vmul.f32 %v4055_v4, %v5561_v30  ;;  %4080 = vrcp.f32 %v3093_v54  ;;  %v3010_v59 = vsub.f32 0.0, %v5670_v28  ;;  %v2940_v55 = vmul.f32 %v5538_v56, %v2901_v7  ;;  %v5685_v13 = vpop.f32.mrf.mxu0 }
 0x210   : > { %v4059_v9 = vpop.eup %4058  ;;  %v3098_v35 = vadd.f32 1.0, %v4057_v46  ;;  %4082 = vpow2.f32 %v3054_v15  ;;  %v3050_v18 = vmul.f32 1.442695, %v3005_v10  ;;  %v5688_v29 = vadd.f32 %v5550_v21, %v2937_v42  ;;  %v3956_v22 = vpop.f32.mrf.mxu1 }
 0x211   : > { %v4061_v20 = vpop.eup %4060  ;;  %3218 = vst [vmem:[%s5677_s21 + $0x10] sm:$0xff] %v3186_v58  ;;  %v3184_v30 = vmul.f32 %v4059_v9, %v5571_v34  ;;  %v3060_v36 = vmul.f32 1.442695, %v3010_v59  ;;  %v5693_v14 = vadd.f32 %v5550_v21, %v2940_v55  ;;  %v2899_v61 = vadd.f32 %v2822_v48, %v2687_v45  ;;  %v5697_v38 = vpop.f32.mrf.mxu0 }
 0x212   : > { %v4063_v8 = vpop.eup %4062  ;;  %4084 = vrcp.f32 %v3098_v35  ;;  %v3096_v50 = vadd.f32 1.0, %v4061_v20  ;;  %v3008_v15 = vsub.f32 0.0, %v5688_v29  ;;  %v2692_v33 = vadd.f32 %v3955_v32, %v5490_v63  ;;  %v2626_v40 = vpop.f32.mrf.mxu1 }
 0x213   : > { %v4065_v51 = vpop.eup %4064  ;;  %3216 = vst [vmem:[%s5677_s21] sm:$0xff] %v3184_v30  ;;  %v3187_v34 = vmul.f32 %v4063_v8, %v5579_v57  ;;  %4086 = vpow2.f32 %v3050_v18  ;;  %v3011_v54 = vsub.f32 0.0, %v5693_v14  ;;  %v2938_v48 = vmul.f32 %v5538_v56, %v2899_v61  ;;  %v5711_v35 = vpop.f32.mrf.mxu0 }
 0x214   : > { %v4067_v7 = vpop.eup %4066  ;;  %4088 = vrcp.f32 %v3096_v50  ;;  %v3099_v4 = vadd.f32 1.0, %v4065_v51  ;;  %v3056_v10 = vmul.f32 1.442695, %v3008_v15  ;;  %v2904_v63 = vadd.f32 %v5658_v12, %v2692_v33  ;;  %v3959_v32 = vpop.f32.mrf.mxu1 }
 0x215   : > { %v4069_v42 = vpop.eup %4068  ;;  %3219 = vst [vmem:[%s5677_s21 + $0x18] sm:$0xff] %v3187_v34  ;;  %v3185_v45 = vmul.f32 %v4067_v7, %v5587_v27  ;;  %4090 = vpow2.f32 %v3060_v36  ;;  %v3062_v46 = vmul.f32 1.442695, %v3011_v54  ;;  %v5707_v57 = vadd.f32 %v5550_v21, %v2938_v48  ;;  %v3994_v51 = vpop.f32.mrf.mxu0 }
 0x216   : > { %4092 = vrcp.f32 %v3099_v4  ;;  %v3097_v58 = vadd.f32 1.0, %v4069_v42  ;;  %v2943_v59 = vmul.f32 %v5538_v56, %v2904_v63  ;;  %v2690_v55 = vadd.f32 %v2623_v47, %v5493_v44  ;;  %v2639_v9 = vpop.f32.mrf.mxu1 }
 0x217   : > { %v4071_v12 = vpop.eup %4070  ;;  %3217 = vst [vmem:[%s5677_s21 + $0x8] sm:$0xff] %v3185_v45  ;;  %4094 = vpow2.f32 %v3056_v10  ;;  %v3009_v27 = vsub.f32 0.0, %v5707_v57  ;;  %v2693_v18 = vadd.f32 %v3956_v22, %v5496_v37  ;;  %v2691_v20 = vadd.f32 %v2626_v40, %v5499_v19 }
 0x218   : > { %v4073_v30 = vpop.eup %4072  ;;  %v3190_v36 = vmul.f32 %v4071_v12, %v5595_v60  ;;  %4096 = vrcp.f32 %v3097_v58  ;;  %v5719_v61 = vadd.f32 %v5550_v21, %v2943_v59  ;;  %v2902_v44 = vadd.f32 %v5664_v6, %v2690_v55  ;;  %v3960_v47 = vpop.f32.mrf.mxu1 }
 0x219   : > { %v4075_v8 = vpop.eup %4074  ;;  %v3102_v50 = vadd.f32 1.0, %v4073_v30  ;;  %4098 = vpow2.f32 %v3062_v46  ;;  %v3058_v15 = vmul.f32 1.442695, %v3009_v27  ;;  %v2905_v33 = vadd.f32 %v5672_v23, %v2693_v18  ;;  %v2854_v46 = vpop.f32.mrf.mxu0 }
 0x21a   : > { %v4077_v37 = vpop.eup %4076  ;;  %3222 = vst [vmem:[%s5677_s21 + $0x30] sm:$0xff] %v3190_v36  ;;  %v3188_v19 = vmul.f32 %v4075_v8, %v5601_v16  ;;  %v3014_v60 = vsub.f32 0.0, %v5719_v61  ;;  %v2941_v22 = vmul.f32 %v5538_v56, %v2902_v44  ;;  %v2903_v40 = vadd.f32 %v5685_v13, %v2691_v20  ;;  %v5728_v6 = vpop.f32.mrf.mxu1 }
 0x21b   : > { %v4079_v34 = vpop.eup %4078  ;;  %4100 = vrcp.f32 %v3102_v50  ;;  %v3100_v54 = vadd.f32 1.0, %v4077_v37  ;;  %v2944_v48 = vmul.f32 %v5538_v56, %v2905_v33  ;;  %v2696_v23 = vadd.f32 %v3959_v32, %v5502_v17 }
 0x21c   : > { %v4081_v7 = vpop.eup %4080  ;;  %3220 = vst [vmem:[%s5677_s21 + $0x20] sm:$0xff] %v3188_v19  ;;  %v3191_v16 = vmul.f32 %v4079_v34, %v5609_v25  ;;  %4102 = vpow2.f32 %v3058_v15  ;;  %v3068_v4 = vmul.f32 1.442695, %v3014_v60  ;;  %v5735_v13 = vadd.f32 %v5550_v21, %v2941_v22  ;;  %v3963_v58 = vpop.f32.mrf.mxu1 }
 0x21d   : > { %v4083_v10 = vpop.eup %4082  ;;  %v3189_v63 = vmul.f32 %v4081_v7, %v5612_v39  ;;  %4104 = vrcp.f32 %v3100_v54  ;;  %v5739_v42 = vadd.f32 %v5550_v21, %v2944_v48  ;;  %v2942_v45 = vmul.f32 %v5538_v56, %v2903_v40 }
 0x21e   : > { %3223 = vst [vmem:[%s5677_s21 + $0x38] sm:$0xff] %v3191_v16  ;;  %v3103_v17 = vadd.f32 1.0, %v4083_v10  ;;  %4106 = vpow2.f32 %v3068_v4  ;;  %v3012_v25 = vsub.f32 0.0, %v5735_v13  ;;  %v2908_v32 = vadd.f32 %v5697_v38, %v2696_v23 }
 0x21f   : > { %v4085_v59 = vpop.eup %4084  ;;  %3221 = vst [vmem:[%s5677_s21 + $0x28] sm:$0xff] %v3189_v63  ;;  %v3015_v39 = vsub.f32 0.0, %v5739_v42  ;;  %v5748_v55 = vadd.f32 %v5550_v21, %v2942_v45  ;;  %v2694_v12 = vadd.f32 %v2639_v9, %v5505_v53  ;;  %v2697_v27 = vadd.f32 %v3960_v47, %v5508_v49  ;;  %v3997_v9 = vpop.f32.mrf.mxu0 }
 0x220   : > { %v4087_v18 = vpop.eup %4086  ;;  %v3194_v20 = vmul.f32 %v4085_v59, %v5620_v11  ;;  %4108 = vrcp.f32 %v3103_v17  ;;  %v3064_v30 = vmul.f32 1.442695, %v3012_v25  ;;  %v2947_v38 = vmul.f32 %v5538_v56, %v2908_v32  ;;  %v2655_v47 = vpop.f32.mrf.mxu1 }
 0x221   : > { %v4089_v36 = vpop.eup %4088  ;;  %v3101_v44 = vadd.f32 1.0, %v4087_v18  ;;  %v3070_v8 = vmul.f32 1.442695, %v3015_v39  ;;  %v3013_v50 = vsub.f32 0.0, %v5748_v55  ;;  %v2906_v15 = vadd.f32 %v5711_v35, %v2694_v12  ;;  %v2867_v10 = vpop.f32.mrf.mxu0 }
 0x222   : > { %v4091_v33 = vpop.eup %4090  ;;  %3226 = vst [vmem:[%s5677_s21 + $0x50] sm:$0xff] %v3194_v20  ;;  %v3192_v53 = vmul.f32 %v4089_v36, %v5626_v31  ;;  %4110 = vpow2.f32 %v3064_v30  ;;  %v5759_v49 = vadd.f32 %v5550_v21, %v2947_v38  ;;  %v2909_v11 = vadd.f32 %v3994_v51, %v2697_v27  ;;  %v3964_v63 = vpop.f32.mrf.mxu1 }
 0x223   : > { %v4093_v37 = vpop.eup %4092  ;;  %4112 = vrcp.f32 %v3101_v44  ;;  %v3106_v19 = vadd.f32 1.0, %v4091_v33  ;;  %v3066_v60 = vmul.f32 1.442695, %v3013_v50  ;;  %v2945_v22 = vmul.f32 %v5538_v56, %v2906_v15  ;;  %v3998_v36 = vpop.f32.mrf.mxu0 }
 0x224   : > { %v4095_v40 = vpop.eup %4094  ;;  %3224 = vst [vmem:[%s5677_s21 + $0x40] sm:$0xff] %v3192_v53  ;;  %v3195_v35 = vmul.f32 %v4093_v37, %v5632_v5  ;;  %4114 = vpow2.f32 %v3070_v8  ;;  %v3018_v31 = vsub.f32 0.0, %v5759_v49  ;;  %v2948_v34 = vmul.f32 %v5538_v56, %v2909_v11  ;;  %v2658_v44 = vpop.f32.mrf.mxu1 }
 0x225   : > { %v4097_v54 = vpop.eup %4096  ;;  %4116 = vrcp.f32 %v3106_v19  ;;  %v3104_v51 = vadd.f32 1.0, %v4095_v40  ;;  %v5767_v48 = vadd.f32 %v5550_v21, %v2945_v22  ;;  %v2695_v23 = vadd.f32 %v5728_v6, %v5511_v1  ;;  %v2870_v37 = vpop.f32.mrf.mxu0 }
 0x226   : > { %v4099_v7 = vpop.eup %4098  ;;  %3227 = vst [vmem:[%s5677_s21 + $0x58] sm:$0xff] %v3195_v35  ;;  %v3193_v16 = vmul.f32 %v4097_v54, %v5637_v3  ;;  %4118 = vpow2.f32 %v3066_v60  ;;  %v3076_v5 = vmul.f32 1.442695, %v3018_v31  ;;  %v5774_v4 = vadd.f32 %v5550_v21, %v2948_v34 }
 0x227   : > { %4120 = vrcp.f32 %v3104_v51  ;;  %v3107_v45 = vadd.f32 1.0, %v4099_v7  ;;  %v3016_v17 = vsub.f32 0.0, %v5767_v48  ;;  %v2907_v25 = vadd.f32 %v2854_v46, %v2695_v23 }
 0x228   : > { %v4101_v32 = vpop.eup %4100  ;;  %3225 = vst [vmem:[%s5677_s21 + $0x48] sm:$0xff] %v3193_v16  ;;  %4122 = vpow2.f32 %v3076_v5  ;;  %v3019_v1 = vsub.f32 0.0, %v5774_v4  ;;  %v2700_v3 = vadd.f32 %v3963_v58, %v5516_v52  ;;  %v2698_v6 = vadd.f32 %v2655_v47, %v5521_v0 }
 0x229   : > { %v4103_v59 = vpop.eup %4102  ;;  %v3198_v39 = vmul.f32 %v4101_v32, %v5642_v2  ;;  %4124 = vrcp.f32 %v3107_v45  ;;  %v3072_v12 = vmul.f32 1.442695, %v3016_v17  ;;  %v2946_v27 = vmul.f32 %v5538_v56, %v2907_v25 }
 0x22a   : > { %v4105_v18 = vpop.eup %4104  ;;  %v3105_v20 = vadd.f32 1.0, %v4103_v59  ;;  %v3078_v46 = vmul.f32 1.442695, %v3019_v1  ;;  %v2912_v30 = vadd.f32 %v3997_v9, %v2700_v3  ;;  %v2910_v38 = vadd.f32 %v2867_v10, %v2698_v6 }
 0x22b   : > { %v4107_v8 = vpop.eup %4106  ;;  %3230 = vst [vmem:[%s5677_s21 + $0x70] sm:$0xff] %v3198_v39  ;;  %v3196_v52 = vmul.f32 %v4105_v18, %v5649_v26  ;;  %4126 = vpow2.f32 %v3072_v12  ;;  %v5786_v0 = vadd.f32 %v5550_v21, %v2946_v27  ;;  %v2701_v2 = vadd.f32 %v3964_v63, %v5527_v43 }
 0x22c   : > { %4128 = vrcp.f32 %v3105_v20  ;;  %v3110_v58 = vadd.f32 1.0, %v4107_v8  ;;  %v2951_v50 = vmul.f32 %v5538_v56, %v2912_v30  ;;  %v2949_v15 = vmul.f32 %v5538_v56, %v2910_v38 }
 0x22d   : > { %v4109_v33 = vpop.eup %4108  ;;  %3228 = vst [vmem:[%s5677_s21 + $0x60] sm:$0xff] %v3196_v52  ;;  %4130 = vpow2.f32 %v3078_v46  ;;  %v3017_v53 = vsub.f32 0.0, %v5786_v0  ;;  %v2913_v11 = vadd.f32 %v3998_v36, %v2701_v2  ;;  %v2699_v26 = vadd.f32 %v2658_v44, %v5533_v24 }
 0x22e   : > { %v3199_v9 = vmul.f32 %v4109_v33, %v5652_v41  ;;  %4132 = vrcp.f32 %v3110_v58  ;;  %v5796_v43 = vadd.f32 %v5550_v21, %v2951_v50  ;;  %v5799_v47 = vadd.f32 %v5550_v21, %v2949_v15 }
 0x22f   : > { %v4111_v19 = vpop.eup %4110  ;;  %v3074_v60 = vmul.f32 1.442695, %v3017_v53  ;;  %v2952_v22 = vmul.f32 %v5538_v56, %v2913_v11  ;;  %v2911_v40 = vadd.f32 %v2870_v37, %v2699_v26 }
 0x230   : > { %v4113_v35 = vpop.eup %4112  ;;  %3231 = vst [vmem:[%s5677_s21 + $0x78] sm:$0xff] %v3199_v9  ;;  %v3108_v31 = vadd.f32 1.0, %v4111_v19  ;;  %v3022_v24 = vsub.f32 0.0, %v5796_v43  ;;  %v3020_v41 = vsub.f32 0.0, %v5799_v47 }
 0x231   : > { %v4115_v34 = vpop.eup %4114  ;;  %v3197_v54 = vmul.f32 %v4113_v35, %v5667_v62  ;;  %4134 = vpow2.f32 %v3074_v60  ;;  %v5807_v51 = vadd.f32 %v5550_v21, %v2952_v22  ;;  %v2950_v23 = vmul.f32 %v5538_v56, %v2911_v40 }
 0x232   : > { %v4117_v7 = vpop.eup %4116  ;;  %4136 = vrcp.f32 %v3108_v31  ;;  %v3111_v16 = vadd.f32 1.0, %v4115_v34  ;;  %v3084_v5 = vmul.f32 1.442695, %v3022_v24  ;;  %v3080_v45 = vmul.f32 1.442695, %v3020_v41 }
 0x233   : > { %v4119_v10 = vpop.eup %4118  ;;  %3229 = vst [vmem:[%s5677_s21 + $0x68] sm:$0xff] %v3197_v54  ;;  %v3202_v63 = vmul.f32 %v4117_v7, %v5670_v28  ;;  %v3023_v17 = vsub.f32 0.0, %v5807_v51  ;;  %v5814_v62 = vadd.f32 %v5550_v21, %v2950_v23 }
 0x234   : > { %v4121_v25 = vpop.eup %4120  ;;  %4138 = vrcp.f32 %v3111_v16  ;;  %v3109_v32 = vadd.f32 1.0, %v4119_v10 }
 0x235   : > { %v4123_v1 = vpop.eup %4122  ;;  %3234 = vst [vmem:[%s5677_s21 + $0x90] sm:$0xff] %v3202_v63  ;;  %v3200_v56 = vmul.f32 %v4121_v25, %v5688_v29  ;;  %4140 = vpow2.f32 %v3084_v5  ;;  %v3086_v3 = vmul.f32 1.442695, %v3023_v17  ;;  %v3021_v6 = vsub.f32 0.0, %v5814_v62 }
 0x236   : > { %v4125_v28 = vpop.eup %4124  ;;  %4142 = vrcp.f32 %v3109_v32  ;;  %v3114_v59 = vadd.f32 1.0, %v4123_v1 }
 0x237   : > { %3232 = vst [vmem:[%s5677_s21 + $0x80] sm:$0xff] %v3200_v56  ;;  %v3203_v21 = vmul.f32 %v4125_v28, %v5693_v14  ;;  %4144 = vpow2.f32 %v3080_v45  ;;  %v3082_v39 = vmul.f32 1.442695, %v3021_v6 }
 0x238   : > { %v4127_v12 = vpop.eup %4126  ;;  %4146 = vrcp.f32 %v3114_v59 }
 0x239   : > { %v4129_v27 = vpop.eup %4128  ;;  %3235 = vst [vmem:[%s5677_s21 + $0x98] sm:$0xff] %v3203_v21  ;;  %v3112_v18 = vadd.f32 1.0, %v4127_v12  ;;  %4148 = vpow2.f32 %v3086_v3 }
 0x23a   : > { %v4131_v29 = vpop.eup %4130  ;;  %v3201_v20 = vmul.f32 %v4129_v27, %v5707_v57  ;;  %4150 = vpow2.f32 %v3082_v39 }
 0x23b   : > { %v4133_v46 = vpop.eup %4132  ;;  %4152 = vrcp.f32 %v3112_v18  ;;  %v3115_v30 = vadd.f32 1.0, %v4131_v29 }
 0x23c   : > { %3233 = vst [vmem:[%s5677_s21 + $0x88] sm:$0xff] %v3201_v20  ;;  %v3206_v14 = vmul.f32 %v4133_v46, %v5719_v61 }
 0x23d   : > { %4154 = vrcp.f32 %v3115_v30 }
 0x23e   : > { %v4135_v38 = vpop.eup %4134  ;;  %3238 = vst [vmem:[%s5677_s21 + $0xb0] sm:$0xff] %v3206_v14 }
 0x23f   : > { %v4137_v36 = vpop.eup %4136  ;;  %v3113_v44 = vadd.f32 1.0, %v4135_v38 }
 0x240   : > { %v3204_v8 = vmul.f32 %v4137_v36, %v5735_v13 }
 0x241   : > { %v4139_v52 = vpop.eup %4138  ;;  %4156 = vrcp.f32 %v3113_v44 }
 0x242   : > { %v4141_v57 = vpop.eup %4140  ;;  %3236 = vst [vmem:[%s5677_s21 + $0xa0] sm:$0xff] %v3204_v8  ;;  %v3207_v2 = vmul.f32 %v4139_v52, %v5739_v42 }
 0x243   : > { %v4143_v58 = vpop.eup %4142  ;;  %v3118_v50 = vadd.f32 1.0, %v4141_v57 }
 0x244   : > { %v4145_v15 = vpop.eup %4144  ;;  %3239 = vst [vmem:[%s5677_s21 + $0xb8] sm:$0xff] %v3207_v2  ;;  %v3205_v61 = vmul.f32 %v4143_v58, %v5748_v55 }
 0x245   : > { %v4147_v33 = vpop.eup %4146  ;;  %4158 = vrcp.f32 %v3118_v50  ;;  %v3116_v53 = vadd.f32 1.0, %v4145_v15 }
 0x246   : > { %v4149_v11 = vpop.eup %4148  ;;  %3237 = vst [vmem:[%s5677_s21 + $0xa8] sm:$0xff] %v3205_v61  ;;  %v3210_v13 = vmul.f32 %v4147_v33, %v5759_v49 }
 0x247   : > { %v4151_v26 = vpop.eup %4150  ;;  %4160 = vrcp.f32 %v3116_v53  ;;  %v3119_v42 = vadd.f32 1.0, %v4149_v11 }
 0x248   : > { %v4153_v9 = vpop.eup %4152  ;;  %3242 = vst [vmem:[%s5677_s21 + $0xd0] sm:$0xff] %v3210_v13  ;;  %v3117_v37 = vadd.f32 1.0, %v4151_v26 }
 0x249   : > { %v3208_v19 = vmul.f32 %v4153_v9, %v5767_v48  ;;  %4162 = vrcp.f32 %v3119_v42 }
 0x24a   : > { %v4155_v55 = vpop.eup %4154  ;;  %4164 = vrcp.f32 %v3117_v37 }
 0x24b   : > { %3240 = vst [vmem:[%s5677_s21 + $0xc0] sm:$0xff] %v3208_v19  ;;  %v3211_v60 = vmul.f32 %v4155_v55, %v5774_v4 }
 0x24d   : > { %3243 = vst [vmem:[%s5677_s21 + $0xd8] sm:$0xff] %v3211_v60 }
 0x24e   : > { %v4157_v49 = vpop.eup %4156 }
 0x24f   : > { %v3209_v22 = vmul.f32 %v4157_v49, %v5786_v0 }
 0x251   : > { %3241 = vst [vmem:[%s5677_s21 + $0xc8] sm:$0xff] %v3209_v22 }
 0x252   : > { %v4159_v40 = vpop.eup %4158 }
 0x253   : > { %v3214_v35 = vmul.f32 %v4159_v40, %v5796_v43 }
 0x254   : > { %v4161_v31 = vpop.eup %4160 }
 0x255   : > { %3246 = vst [vmem:[%s5677_s21 + $0xf0] sm:$0xff] %v3214_v35  ;;  %v3212_v48 = vmul.f32 %v4161_v31, %v5799_v47 }
 0x256   : > { %v4163_v24 = vpop.eup %4162 }
 0x257   : > { %v4165_v41 = vpop.eup %4164  ;;  %3244 = vst [vmem:[%s5677_s21 + $0xe0] sm:$0xff] %v3212_v48  ;;  %v3215_v34 = vmul.f32 %v4163_v24, %v5807_v51 }
 0x258   : > { %v3213_v4 = vmul.f32 %v4165_v41, %v5814_v62 }
 0x259   : > { %3247 = vst [vmem:[%s5677_s21 + $0xf8] sm:$0xff] %v3215_v34 }
 0x25a   : > { %3245 = vst [vmem:[%s5677_s21 + $0xe8] sm:$0xff] %v3213_v4 }
 0x25b PF: > { %s14_s15 = sadd.s32 1, %s4172_s15  }
 0x25c   : > { %p11_p4 = scmp.ge.s32.totalorder %s14_s15, 4  }
 0x25e   :  { %13 = sbr.rel (!%p11_p4) target bundleno = 1 (0x1), region = 74 }

</bundles_post_ra>
